<compile_context>
chip_gen: v6e
topology: v6e:2x2x1
jax: 0.10.0
libtpu: 0.0.40
codegen_flags: <defaults>
</compile_context>

<pallas_src>
import functools

import jax
import jax.numpy as jnp
from jax.experimental import pallas as pl
from jax.experimental.pallas import tpu as pltpu


def _style_components_kernel(comp_ref, ref_ref,
                             wq_ref, wkv_ref, wfc_ref,
                             gamma_ref, beta_ref,
                             out_ref,
                             q_scratch, m_scratch, l_scratch, acc_scratch,
                             *, num_heads, head_dim, eps):
    C = num_heads * head_dim
    tn = q_scratch.shape[0]
    ki = pl.program_id(2)
    nk = pl.num_programs(2)
    proj_dtype = comp_ref.dtype

    # ---- init / Q projection once per (b, q-tile) ----------------------------
    @pl.when(ki == 0)
    def _init():
        comp = comp_ref[0]                                             # (tn, C)
        q = jnp.dot(comp, wq_ref[...], preferred_element_type=jnp.float32)
        q_scratch[...] = q.astype(proj_dtype)
        m_scratch[...] = jnp.full(m_scratch.shape, -jnp.inf, jnp.float32)
        l_scratch[...] = jnp.zeros(l_scratch.shape, jnp.float32)
        acc_scratch[...] = jnp.zeros(acc_scratch.shape, jnp.float32)

    # ---- fused K/V projection for this KV tile --------------------------------
    refs = ref_ref[0]                                                  # (tkv, C)
    kv = jnp.dot(refs, wkv_ref[...],
                 preferred_element_type=jnp.float32).astype(proj_dtype)  # (tkv, 2C)
    k = kv[:, :C]
    v = kv[:, C:]

    q = q_scratch[...]                                                 # (tn, C)

    # ---- per-head online-softmax attention (static unroll) --------------------
    alpha_parts = []
    pv_parts = []
    for h in range(num_heads):
        sl = slice(h * head_dim, (h + 1) * head_dim)
        qh = q[:, sl]                                                  # (tn, d)
        kh = k[:, sl]                                                  # (tkv, d)
        vh = v[:, sl]                                                  # (tkv, d)

        # scores[n, kv] = sum_d Q[n,d] * K[kv,d]  (no transpose materialized,
        # and no 1/sqrt(d) scaling -- matches the module).
        scores = jax.lax.dot_general(
            qh, kh, dimension_numbers=(((1,), (1,)), ((), ())),
            preferred_element_type=jnp.float32)                        # (tn, tkv)

        m_prev = m_scratch[h]                                          # (tn, 1)
        m_new = jnp.maximum(m_prev, jnp.max(scores, axis=-1, keepdims=True))
        alpha = jnp.exp(m_prev - m_new)                                # (tn, 1)
        p = jnp.exp(scores - m_new)                                    # (tn, tkv)

        l_scratch[h] = alpha * l_scratch[h] + jnp.sum(p, axis=-1, keepdims=True)
        m_scratch[h] = m_new

        pv_parts.append(jnp.dot(p.astype(proj_dtype), vh,
                                preferred_element_type=jnp.float32))   # (tn, d)
        alpha_parts.append(jnp.broadcast_to(alpha, (tn, head_dim)))    # (tn, d)

    # Single lane-dense read-modify-write of the (tn, C) accumulator per KV step.
    alpha_full = jnp.concatenate(alpha_parts, axis=-1)                 # (tn, C)
    pv_full = jnp.concatenate(pv_parts, axis=-1)                       # (tn, C)
    acc_scratch[...] = alpha_full * acc_scratch[...] + pv_full

    # ---- finalize: normalize, fused concat-FC, residual + LayerNorm -----------
    @pl.when(ki == nk - 1)
    def _finalize():
        # Exact division: runs once per output tile, so cost is negligible.
        inv_parts = [jnp.broadcast_to(1.0 / l_scratch[h], (tn, head_dim))
                     for h in range(num_heads)]
        inv_full = jnp.concatenate(inv_parts, axis=-1)                 # (tn, C)

        o_cat = (acc_scratch[...] * inv_full).astype(proj_dtype)       # heads concat
        fc = jnp.dot(o_cat, wfc_ref[...], preferred_element_type=jnp.float32)

        y = fc + comp_ref[0].astype(jnp.float32)                       # residual
        mean = jnp.mean(y, axis=-1, keepdims=True)
        var = jnp.mean((y - mean) ** 2, axis=-1, keepdims=True)
        normed = (y - mean) * jax.lax.rsqrt(var + eps)
        out_ref[0] = (normed * gamma_ref[...] + beta_ref[...]).astype(out_ref.dtype)


def _pick_tile(total, candidates):
    for c in candidates:
        if c <= total and total % c == 0:
            return c
    return total


def get_style_components(component_sequence, reference_map_list,
                         wq, wk, wv, wfc, ln_gamma, ln_beta,
                         *, num_heads):
    """component_sequence: (B, N, C); reference_map_list: (B, K, C, H, W)."""
    B, N, C = component_sequence.shape
    _, K, Cr, H, W = reference_map_list.shape
    assert Cr == C and C % num_heads == 0
    head_dim = C // num_heads
    KHW = K * H * W

    # rearrange 'b k c h w -> b (k h w) c'
    # TODO(synk): fold this rearrange into the producer (or DMA per KV tile from an
    # HBM-resident NCHW ref in-kernel) to avoid a full HBM round-trip.
    ref_seq = jnp.transpose(reference_map_list, (0, 1, 3, 4, 2)).reshape(B, KHW, C)

    # nn.Linear (y = x @ W.T): pass transposed weights. Fuse K and V weights.
    wq_t = wq.T                                        # (C, C)
    wkv_t = jnp.concatenate([wk.T, wv.T], axis=1)      # (C, 2C)
    wfc_t = wfc.T                                      # (C, C)
    gamma2d = ln_gamma.reshape(1, C)
    beta2d = ln_beta.reshape(1, C)

    # Tile sizes: (8,128)-friendly candidates that divide the extent, else full.
    tn = _pick_tile(N, (256, 128))
    tkv = _pick_tile(KHW, (1024, 512, 256, 128))
    grid = (B, N // tn, KHW // tkv)

    kernel = functools.partial(_style_components_kernel,
                               num_heads=num_heads, head_dim=head_dim, eps=1e-6)

    weight_q_spec = pl.BlockSpec((C, C), lambda b, qi, ki: (0, 0))
    weight_kv_spec = pl.BlockSpec((C, 2 * C), lambda b, qi, ki: (0, 0))
    weight_fc_spec = pl.BlockSpec((C, C), lambda b, qi, ki: (0, 0))
    vec_spec = pl.BlockSpec((1, C), lambda b, qi, ki: (0, 0))

    # Scoped-VMEM budget: double-buffered I/O tiles + weights + scratch + in-body
    # f32 intermediates, with headroom; capped at 64 MiB so it is valid on v7x.
    isz = jnp.dtype(component_sequence.dtype).itemsize
    weight_bytes = (C * C + C * 2 * C + C * C + 2 * C) * isz
    io_bytes = (tn * C + tkv * C + tn * C) * isz
    scratch_bytes = tn * C * isz + tn * C * 4 + 2 * num_heads * tn * 128 * 4
    body_bytes = (2 * tn * tkv + tkv * 2 * C + 3 * tn * C) * 4
    est = 2 * (weight_bytes + io_bytes) + scratch_bytes + body_bytes
    vmem_limit = int(min(max(2 * est, 32 * 1024 * 1024), 64 * 1024 * 1024))

    return pl.pallas_call(
        kernel,
        out_shape=jax.ShapeDtypeStruct((B, N, C), component_sequence.dtype),
        grid_spec=pltpu.PrefetchScalarGridSpec(
            num_scalar_prefetch=0,
            grid=grid,
            in_specs=[
                pl.BlockSpec((1, tn, C), lambda b, qi, ki: (b, qi, 0)),    # comp
                pl.BlockSpec((1, tkv, C), lambda b, qi, ki: (b, ki, 0)),   # refs
                weight_q_spec,                                             # Wq^T
                weight_kv_spec,                                            # [Wk^T|Wv^T]
                weight_fc_spec,                                            # Wfc^T
                vec_spec,                                                  # LN gamma
                vec_spec,                                                  # LN beta
            ],
            out_specs=pl.BlockSpec((1, tn, C), lambda b, qi, ki: (b, qi, 0)),
            scratch_shapes=[
                pltpu.VMEM((tn, C), component_sequence.dtype),   # Q cache
                pltpu.VMEM((num_heads, tn, 1), jnp.float32),     # running max
                pltpu.VMEM((num_heads, tn, 1), jnp.float32),     # running sum
                pltpu.VMEM((tn, C), jnp.float32),                # PV accumulator
            ],
        ),
        compiler_params=pltpu.CompilerParams(
            dimension_semantics=("parallel", "parallel", "arbitrary"),
            vmem_limit_bytes=vmem_limit),
    )(component_sequence, ref_seq, wq_t, wkv_t, wfc_t, gamma2d, beta2d)


def _reference_jax(component_sequence, reference_map_list,
                   wq, wk, wv, wfc, ln_gamma, ln_beta, *, num_heads):
    """Pure-JAX reference mirroring the PyTorch module exactly."""
    B, N, C = component_sequence.shape
    _, K, _, H, W = reference_map_list.shape
    d = C // num_heads
    m = num_heads

    ref_seq = jnp.transpose(reference_map_list, (0, 1, 3, 4, 2)).reshape(B, K * H * W, C)
    key = (ref_seq @ wk.T).reshape(B, K * H * W, m, d).transpose(0, 2, 1, 3)       # b m khw d
    value = (ref_seq @ wv.T).reshape(B, K * H * W, m, d).transpose(0, 2, 1, 3)     # b m khw d
    query = (component_sequence @ wq.T).reshape(B, N, m, d).transpose(0, 2, 3, 1)  # b m d n

    scores = jnp.einsum('bmkd,bmdn->bmkn', key, query)
    scores = jnp.transpose(scores, (0, 1, 3, 2))                                   # b m n khw
    p_attn = jax.nn.softmax(scores, axis=-1)
    out = jnp.einsum('bmnk,bmkd->bmnd', p_attn, value)
    out = jnp.transpose(out, (0, 2, 1, 3)).reshape(B, N, C)                        # b n (m d)
    out = out @ wfc.T
    y = out + component_sequence
    mean = jnp.mean(y, axis=-1, keepdims=True)
    var = jnp.mean((y - mean) ** 2, axis=-1, keepdims=True)
    return (y - mean) * jax.lax.rsqrt(var + 1e-6) * ln_gamma + ln_beta


if __name__ == "__main__":
    # Small shapes consistent with the module (C divisible by num_heads).
    B, N, C = 2, 8, 32
    num_heads = 4
    K, H, W = 2, 4, 4

    key = jax.random.PRNGKey(0)
    k_comp, k_ref, k_wq, k_wk, k_wv, k_wfc = jax.random.split(key, 6)

    component_sequence = jax.random.normal(k_comp, (B, N, C), dtype=jnp.float32)
    reference_map_list = jax.random.normal(k_ref, (B, K, C, H, W), dtype=jnp.float32)

    # Deterministic synthetic parameters (nn.Linear weights are (out, in), no bias).
    scale = 1.0 / jnp.sqrt(jnp.float32(C))
    wq = jax.random.normal(k_wq, (C, C), dtype=jnp.float32) * scale
    wk = jax.random.normal(k_wk, (C, C), dtype=jnp.float32) * scale
    wv = jax.random.normal(k_wv, (C, C), dtype=jnp.float32) * scale
    wfc = jax.random.normal(k_wfc, (C, C), dtype=jnp.float32) * scale
    ln_gamma = jnp.ones((C,), dtype=jnp.float32)   # LayerNorm default init
    ln_beta = jnp.zeros((C,), dtype=jnp.float32)

    out = get_style_components(component_sequence, reference_map_list,
                               wq, wk, wv, wfc, ln_gamma, ln_beta,
                               num_heads=num_heads)
    out = jax.block_until_ready(out)

    ref = _reference_jax(component_sequence, reference_map_list,
                         wq, wk, wv, wfc, ln_gamma, ln_beta, num_heads=num_heads)
    assert out.shape == (B, N, C)
    assert jnp.allclose(out, ref, rtol=5e-3, atol=5e-3), "mismatch vs reference"

    print("KERNEL_OK")
</pallas_src>

<mosaic_0001>
module attributes {stable_mosaic.version = 11 : i64} {
  func.func @_style_components_kernel(%arg0: i32, %arg1: i32, %arg2: i32, %arg3: memref<1x8x32xf32, #tpu.memory_space<vmem>>, %arg4: memref<1x32x32xf32, #tpu.memory_space<vmem>>, %arg5: memref<32x32xf32, #tpu.memory_space<vmem>>, %arg6: memref<32x64xf32, #tpu.memory_space<vmem>>, %arg7: memref<32x32xf32, #tpu.memory_space<vmem>>, %arg8: memref<1x32xf32, #tpu.memory_space<vmem>>, %arg9: memref<1x32xf32, #tpu.memory_space<vmem>>, %arg10: memref<1x8x32xf32, #tpu.memory_space<vmem>>, %arg11: memref<8x32xf32, #tpu.memory_space<vmem>>, %arg12: memref<4x8x1xf32, #tpu.memory_space<vmem>>, %arg13: memref<4x8x1xf32, #tpu.memory_space<vmem>>, %arg14: memref<8x32xf32, #tpu.memory_space<vmem>>) attributes {dimension_semantics = [#tpu.dimension_semantics<parallel>, #tpu.dimension_semantics<parallel>, #tpu.dimension_semantics<arbitrary>], iteration_bounds = array<i64: 2, 1, 1>, scalar_prefetch = 0 : i64, scratch_operands = 4 : i64, tpu.core_type = #tpu.core_type<tc>, window_params = [{transform_indices = @transform_0, window_bounds = array<i64: 1, 8, 32>}, {transform_indices = @transform_1, window_bounds = array<i64: 1, 32, 32>}, {pipeline_mode = #tpu.pipeline_mode<synchronous>, transform_indices = @transform_2, window_bounds = array<i64: 32, 32>}, {pipeline_mode = #tpu.pipeline_mode<synchronous>, transform_indices = @transform_3, window_bounds = array<i64: 32, 64>}, {pipeline_mode = #tpu.pipeline_mode<synchronous>, transform_indices = @transform_4, window_bounds = array<i64: 32, 32>}, {pipeline_mode = #tpu.pipeline_mode<synchronous>, transform_indices = @transform_5, window_bounds = array<i64: 1, 32>}, {pipeline_mode = #tpu.pipeline_mode<synchronous>, transform_indices = @transform_6, window_bounds = array<i64: 1, 32>}, {transform_indices = @transform_7, window_bounds = array<i64: 1, 8, 32>}]} {
    %c0_i32 = arith.constant 0 : i32
    %0 = arith.cmpi eq, %arg2, %c0_i32 : i32
    %1 = arith.extui %0 : i1 to i32
    %c0_i32_0 = arith.constant 0 : i32
    %2 = arith.cmpi ne, %1, %c0_i32_0 : i32
    scf.if %2 {
      %c0_74 = arith.constant 0 : index
      %c0_75 = arith.constant 0 : index
      %c0_76 = arith.constant 0 : index
      %135 = vector.load %arg3[%c0_74, %c0_75, %c0_76] : memref<1x8x32xf32, #tpu.memory_space<vmem>>, vector<1x8x32xf32>
      %136 = vector.shape_cast %135 : vector<1x8x32xf32> to vector<8x32xf32>
      %c0_77 = arith.constant 0 : index
      %c0_78 = arith.constant 0 : index
      %137 = vector.load %arg5[%c0_77, %c0_78] : memref<32x32xf32, #tpu.memory_space<vmem>>, vector<32x32xf32>
      %cst_79 = arith.constant dense<0.000000e+00> : vector<8x32xf32>
      %138 = tpu.matmul %136, %137, %cst_79 {dimension_numbers = #tpu.dot_dimension_numbers<[1], [0], [0], [1], [0, 0, 1, 1], [], []>} : vector<8x32xf32>, vector<32x32xf32>, vector<8x32xf32> -> vector<8x32xf32>
      %c0_80 = arith.constant 0 : index
      %c0_81 = arith.constant 0 : index
      %139 = vector.load %arg11[%c0_80, %c0_81] : memref<8x32xf32, #tpu.memory_space<vmem>>, vector<8x32xf32>
      tpu.vector_store %arg11[%c0_80, %c0_81], %138 {strides = array<i32>} : memref<8x32xf32, #tpu.memory_space<vmem>>, vector<8x32xf32>,
      %cst_82 = arith.constant 0xFF800000 : f32
      %140 = vector.broadcast %cst_82 : f32 to vector<4x8x1xf32>
      %c0_83 = arith.constant 0 : index
      %c0_84 = arith.constant 0 : index
      %c0_85 = arith.constant 0 : index
      %141 = vector.load %arg12[%c0_83, %c0_84, %c0_85] : memref<4x8x1xf32, #tpu.memory_space<vmem>>, vector<4x8x1xf32>
      tpu.vector_store %arg12[%c0_83, %c0_84, %c0_85], %140 {strides = array<i32>} : memref<4x8x1xf32, #tpu.memory_space<vmem>>, vector<4x8x1xf32>,
      %cst_86 = arith.constant 0.000000e+00 : f32
      %142 = vector.broadcast %cst_86 : f32 to vector<4x8x1xf32>
      %c0_87 = arith.constant 0 : index
      %c0_88 = arith.constant 0 : index
      %c0_89 = arith.constant 0 : index
      %143 = vector.load %arg13[%c0_87, %c0_88, %c0_89] : memref<4x8x1xf32, #tpu.memory_space<vmem>>, vector<4x8x1xf32>
      tpu.vector_store %arg13[%c0_87, %c0_88, %c0_89], %142 {strides = array<i32>} : memref<4x8x1xf32, #tpu.memory_space<vmem>>, vector<4x8x1xf32>,
      %cst_90 = arith.constant 0.000000e+00 : f32
      %144 = vector.broadcast %cst_90 : f32 to vector<8x32xf32>
      %c0_91 = arith.constant 0 : index
      %c0_92 = arith.constant 0 : index
      %145 = vector.load %arg14[%c0_91, %c0_92] : memref<8x32xf32, #tpu.memory_space<vmem>>, vector<8x32xf32>
      tpu.vector_store %arg14[%c0_91, %c0_92], %144 {strides = array<i32>} : memref<8x32xf32, #tpu.memory_space<vmem>>, vector<8x32xf32>,
    } else {
    }
    %c0 = arith.constant 0 : index
    %c0_1 = arith.constant 0 : index
    %c0_2 = arith.constant 0 : index
    %3 = vector.load %arg4[%c0, %c0_1, %c0_2] : memref<1x32x32xf32, #tpu.memory_space<vmem>>, vector<1x32x32xf32>
    %4 = vector.shape_cast %3 : vector<1x32x32xf32> to vector<32x32xf32>
    %c0_3 = arith.constant 0 : index
    %c0_4 = arith.constant 0 : index
    %5 = vector.load %arg6[%c0_3, %c0_4] : memref<32x64xf32, #tpu.memory_space<vmem>>, vector<32x64xf32>
    %cst = arith.constant dense<0.000000e+00> : vector<32x64xf32>
    %6 = tpu.matmul %4, %5, %cst {dimension_numbers = #tpu.dot_dimension_numbers<[1], [0], [0], [1], [0, 0, 1, 1], [], []>} : vector<32x32xf32>, vector<32x64xf32>, vector<32x64xf32> -> vector<32x64xf32>
    %7 = vector.extract_strided_slice %6 {offsets = [0, 0], sizes = [32, 32], strides = [1, 1]} : vector<32x64xf32> to vector<32x32xf32>
    %8 = vector.extract_strided_slice %6 {offsets = [0, 32], sizes = [32, 32], strides = [1, 1]} : vector<32x64xf32> to vector<32x32xf32>
    %c0_5 = arith.constant 0 : index
    %c0_6 = arith.constant 0 : index
    %9 = vector.load %arg11[%c0_5, %c0_6] : memref<8x32xf32, #tpu.memory_space<vmem>>, vector<8x32xf32>
    %10 = vector.extract_strided_slice %9 {offsets = [0, 0], sizes = [8, 8], strides = [1, 1]} : vector<8x32xf32> to vector<8x8xf32>
    %11 = vector.extract_strided_slice %7 {offsets = [0, 0], sizes = [32, 8], strides = [1, 1]} : vector<32x32xf32> to vector<32x8xf32>
    %12 = vector.extract_strided_slice %8 {offsets = [0, 0], sizes = [32, 8], strides = [1, 1]} : vector<32x32xf32> to vector<32x8xf32>
    %cst_7 = arith.constant dense<0.000000e+00> : vector<8x32xf32>
    %13 = tpu.matmul %10, %11, %cst_7 {dimension_numbers = #tpu.dot_dimension_numbers<[1], [1], [0], [0], [0, 0, 1, 0], [], []>} : vector<8x8xf32>, vector<32x8xf32>, vector<8x32xf32> -> vector<8x32xf32>
    %c0_8 = arith.constant 0 : index
    %c0_9 = arith.constant 0 : index
    %c0_10 = arith.constant 0 : index
    %14 = vector.load %arg12[%c0_8, %c0_9, %c0_10] : memref<4x8x1xf32, #tpu.memory_space<vmem>>, vector<1x8x1xf32>
    %15 = vector.shape_cast %14 : vector<1x8x1xf32> to vector<8x1xf32>
    %cst_11 = arith.constant dense<0xFF800000> : vector<8xf32>
    %16 = vector.multi_reduction <maximumf>, %13, %cst_11 [1] : vector<8x32xf32> to vector<8xf32>
    %17 = vector.shape_cast %16 : vector<8xf32> to vector<8x1xf32>
    %18 = arith.maximumf %15, %17 : vector<8x1xf32>
    %19 = arith.subf %15, %18 : vector<8x1xf32>
    %20 = math.exp %19 : vector<8x1xf32>
    %21 = vector.broadcast %18 : vector<8x1xf32> to vector<8x32xf32>
    %22 = arith.subf %13, %21 : vector<8x32xf32>
    %23 = math.exp %22 : vector<8x32xf32>
    %c0_12 = arith.constant 0 : index
    %c0_13 = arith.constant 0 : index
    %c0_14 = arith.constant 0 : index
    %24 = vector.load %arg13[%c0_12, %c0_13, %c0_14] : memref<4x8x1xf32, #tpu.memory_space<vmem>>, vector<1x8x1xf32>
    %25 = vector.shape_cast %24 : vector<1x8x1xf32> to vector<8x1xf32>
    %26 = arith.mulf %20, %25 : vector<8x1xf32>
    %cst_15 = arith.constant dense<0.000000e+00> : vector<8xf32>
    %27 = vector.multi_reduction <add>, %23, %cst_15 [1] : vector<8x32xf32> to vector<8xf32>
    %28 = vector.shape_cast %27 : vector<8xf32> to vector<8x1xf32>
    %29 = arith.addf %26, %28 : vector<8x1xf32>
    %c0_16 = arith.constant 0 : index
    %c0_17 = arith.constant 0 : index
    %c0_18 = arith.constant 0 : index
    %30 = vector.load %arg13[%c0_16, %c0_17, %c0_18] : memref<4x8x1xf32, #tpu.memory_space<vmem>>, vector<1x8x1xf32>
    %31 = vector.shape_cast %30 : vector<1x8x1xf32> to vector<8x1xf32>
    %32 = vector.shape_cast %29 : vector<8x1xf32> to vector<1x8x1xf32>
    tpu.vector_store %arg13[%c0_16, %c0_17, %c0_18], %32 {strides = array<i32>} : memref<4x8x1xf32, #tpu.memory_space<vmem>>, vector<1x8x1xf32>,
    %c0_19 = arith.constant 0 : index
    %c0_20 = arith.constant 0 : index
    %c0_21 = arith.constant 0 : index
    %33 = vector.load %arg12[%c0_19, %c0_20, %c0_21] : memref<4x8x1xf32, #tpu.memory_space<vmem>>, vector<1x8x1xf32>
    %34 = vector.shape_cast %33 : vector<1x8x1xf32> to vector<8x1xf32>
    %35 = vector.shape_cast %18 : vector<8x1xf32> to vector<1x8x1xf32>
    tpu.vector_store %arg12[%c0_19, %c0_20, %c0_21], %35 {strides = array<i32>} : memref<4x8x1xf32, #tpu.memory_space<vmem>>, vector<1x8x1xf32>,
    %cst_22 = arith.constant dense<0.000000e+00> : vector<8x8xf32>
    %36 = tpu.matmul %23, %12, %cst_22 {dimension_numbers = #tpu.dot_dimension_numbers<[1], [0], [0], [1], [0, 0, 1, 1], [], []>} : vector<8x32xf32>, vector<32x8xf32>, vector<8x8xf32> -> vector<8x8xf32>
    %37 = vector.shape_cast %20 : vector<8x1xf32> to vector<8x1xf32>
    %38 = vector.broadcast %37 : vector<8x1xf32> to vector<8x8xf32>
    %39 = vector.extract_strided_slice %9 {offsets = [0, 8], sizes = [8, 8], strides = [1, 1]} : vector<8x32xf32> to vector<8x8xf32>
    %40 = vector.extract_strided_slice %7 {offsets = [0, 8], sizes = [32, 8], strides = [1, 1]} : vector<32x32xf32> to vector<32x8xf32>
    %41 = vector.extract_strided_slice %8 {offsets = [0, 8], sizes = [32, 8], strides = [1, 1]} : vector<32x32xf32> to vector<32x8xf32>
    %cst_23 = arith.constant dense<0.000000e+00> : vector<8x32xf32>
    %42 = tpu.matmul %39, %40, %cst_23 {dimension_numbers = #tpu.dot_dimension_numbers<[1], [1], [0], [0], [0, 0, 1, 0], [], []>} : vector<8x8xf32>, vector<32x8xf32>, vector<8x32xf32> -> vector<8x32xf32>
    %c1 = arith.constant 1 : index
    %c0_24 = arith.constant 0 : index
    %c0_25 = arith.constant 0 : index
    %43 = vector.load %arg12[%c1, %c0_24, %c0_25] : memref<4x8x1xf32, #tpu.memory_space<vmem>>, vector<1x8x1xf32>
    %44 = vector.shape_cast %43 : vector<1x8x1xf32> to vector<8x1xf32>
    %cst_26 = arith.constant dense<0xFF800000> : vector<8xf32>
    %45 = vector.multi_reduction <maximumf>, %42, %cst_26 [1] : vector<8x32xf32> to vector<8xf32>
    %46 = vector.shape_cast %45 : vector<8xf32> to vector<8x1xf32>
    %47 = arith.maximumf %44, %46 : vector<8x1xf32>
    %48 = arith.subf %44, %47 : vector<8x1xf32>
    %49 = math.exp %48 : vector<8x1xf32>
    %50 = vector.broadcast %47 : vector<8x1xf32> to vector<8x32xf32>
    %51 = arith.subf %42, %50 : vector<8x32xf32>
    %52 = math.exp %51 : vector<8x32xf32>
    %c1_27 = arith.constant 1 : index
    %c0_28 = arith.constant 0 : index
    %c0_29 = arith.constant 0 : index
    %53 = vector.load %arg13[%c1_27, %c0_28, %c0_29] : memref<4x8x1xf32, #tpu.memory_space<vmem>>, vector<1x8x1xf32>
    %54 = vector.shape_cast %53 : vector<1x8x1xf32> to vector<8x1xf32>
    %55 = arith.mulf %49, %54 : vector<8x1xf32>
    %cst_30 = arith.constant dense<0.000000e+00> : vector<8xf32>
    %56 = vector.multi_reduction <add>, %52, %cst_30 [1] : vector<8x32xf32> to vector<8xf32>
    %57 = vector.shape_cast %56 : vector<8xf32> to vector<8x1xf32>
    %58 = arith.addf %55, %57 : vector<8x1xf32>
    %c1_31 = arith.constant 1 : index
    %c0_32 = arith.constant 0 : index
    %c0_33 = arith.constant 0 : index
    %59 = vector.load %arg13[%c1_31, %c0_32, %c0_33] : memref<4x8x1xf32, #tpu.memory_space<vmem>>, vector<1x8x1xf32>
    %60 = vector.shape_cast %59 : vector<1x8x1xf32> to vector<8x1xf32>
    %61 = vector.shape_cast %58 : vector<8x1xf32> to vector<1x8x1xf32>
    tpu.vector_store %arg13[%c1_31, %c0_32, %c0_33], %61 {strides = array<i32>} : memref<4x8x1xf32, #tpu.memory_space<vmem>>, vector<1x8x1xf32>,
    %c1_34 = arith.constant 1 : index
    %c0_35 = arith.constant 0 : index
    %c0_36 = arith.constant 0 : index
    %62 = vector.load %arg12[%c1_34, %c0_35, %c0_36] : memref<4x8x1xf32, #tpu.memory_space<vmem>>, vector<1x8x1xf32>
    %63 = vector.shape_cast %62 : vector<1x8x1xf32> to vector<8x1xf32>
    %64 = vector.shape_cast %47 : vector<8x1xf32> to vector<1x8x1xf32>
    tpu.vector_store %arg12[%c1_34, %c0_35, %c0_36], %64 {strides = array<i32>} : memref<4x8x1xf32, #tpu.memory_space<vmem>>, vector<1x8x1xf32>,
    %cst_37 = arith.constant dense<0.000000e+00> : vector<8x8xf32>
    %65 = tpu.matmul %52, %41, %cst_37 {dimension_numbers = #tpu.dot_dimension_numbers<[1], [0], [0], [1], [0, 0, 1, 1], [], []>} : vector<8x32xf32>, vector<32x8xf32>, vector<8x8xf32> -> vector<8x8xf32>
    %66 = vector.shape_cast %49 : vector<8x1xf32> to vector<8x1xf32>
    %67 = vector.broadcast %66 : vector<8x1xf32> to vector<8x8xf32>
    %68 = vector.extract_strided_slice %9 {offsets = [0, 16], sizes = [8, 8], strides = [1, 1]} : vector<8x32xf32> to vector<8x8xf32>
    %69 = vector.extract_strided_slice %7 {offsets = [0, 16], sizes = [32, 8], strides = [1, 1]} : vector<32x32xf32> to vector<32x8xf32>
    %70 = vector.extract_strided_slice %8 {offsets = [0, 16], sizes = [32, 8], strides = [1, 1]} : vector<32x32xf32> to vector<32x8xf32>
    %cst_38 = arith.constant dense<0.000000e+00> : vector<8x32xf32>
    %71 = tpu.matmul %68, %69, %cst_38 {dimension_numbers = #tpu.dot_dimension_numbers<[1], [1], [0], [0], [0, 0, 1, 0], [], []>} : vector<8x8xf32>, vector<32x8xf32>, vector<8x32xf32> -> vector<8x32xf32>
    %c2 = arith.constant 2 : index
    %c0_39 = arith.constant 0 : index
    %c0_40 = arith.constant 0 : index
    %72 = vector.load %arg12[%c2, %c0_39, %c0_40] : memref<4x8x1xf32, #tpu.memory_space<vmem>>, vector<1x8x1xf32>
    %73 = vector.shape_cast %72 : vector<1x8x1xf32> to vector<8x1xf32>
    %cst_41 = arith.constant dense<0xFF800000> : vector<8xf32>
    %74 = vector.multi_reduction <maximumf>, %71, %cst_41 [1] : vector<8x32xf32> to vector<8xf32>
    %75 = vector.shape_cast %74 : vector<8xf32> to vector<8x1xf32>
    %76 = arith.maximumf %73, %75 : vector<8x1xf32>
    %77 = arith.subf %73, %76 : vector<8x1xf32>
    %78 = math.exp %77 : vector<8x1xf32>
    %79 = vector.broadcast %76 : vector<8x1xf32> to vector<8x32xf32>
    %80 = arith.subf %71, %79 : vector<8x32xf32>
    %81 = math.exp %80 : vector<8x32xf32>
    %c2_42 = arith.constant 2 : index
    %c0_43 = arith.constant 0 : index
    %c0_44 = arith.constant 0 : index
    %82 = vector.load %arg13[%c2_42, %c0_43, %c0_44] : memref<4x8x1xf32, #tpu.memory_space<vmem>>, vector<1x8x1xf32>
    %83 = vector.shape_cast %82 : vector<1x8x1xf32> to vector<8x1xf32>
    %84 = arith.mulf %78, %83 : vector<8x1xf32>
    %cst_45 = arith.constant dense<0.000000e+00> : vector<8xf32>
    %85 = vector.multi_reduction <add>, %81, %cst_45 [1] : vector<8x32xf32> to vector<8xf32>
    %86 = vector.shape_cast %85 : vector<8xf32> to vector<8x1xf32>
    %87 = arith.addf %84, %86 : vector<8x1xf32>
    %c2_46 = arith.constant 2 : index
    %c0_47 = arith.constant 0 : index
    %c0_48 = arith.constant 0 : index
    %88 = vector.load %arg13[%c2_46, %c0_47, %c0_48] : memref<4x8x1xf32, #tpu.memory_space<vmem>>, vector<1x8x1xf32>
    %89 = vector.shape_cast %88 : vector<1x8x1xf32> to vector<8x1xf32>
    %90 = vector.shape_cast %87 : vector<8x1xf32> to vector<1x8x1xf32>
    tpu.vector_store %arg13[%c2_46, %c0_47, %c0_48], %90 {strides = array<i32>} : memref<4x8x1xf32, #tpu.memory_space<vmem>>, vector<1x8x1xf32>,
    %c2_49 = arith.constant 2 : index
    %c0_50 = arith.constant 0 : index
    %c0_51 = arith.constant 0 : index
    %91 = vector.load %arg12[%c2_49, %c0_50, %c0_51] : memref<4x8x1xf32, #tpu.memory_space<vmem>>, vector<1x8x1xf32>
    %92 = vector.shape_cast %91 : vector<1x8x1xf32> to vector<8x1xf32>
    %93 = vector.shape_cast %76 : vector<8x1xf32> to vector<1x8x1xf32>
    tpu.vector_store %arg12[%c2_49, %c0_50, %c0_51], %93 {strides = array<i32>} : memref<4x8x1xf32, #tpu.memory_space<vmem>>, vector<1x8x1xf32>,
    %cst_52 = arith.constant dense<0.000000e+00> : vector<8x8xf32>
    %94 = tpu.matmul %81, %70, %cst_52 {dimension_numbers = #tpu.dot_dimension_numbers<[1], [0], [0], [1], [0, 0, 1, 1], [], []>} : vector<8x32xf32>, vector<32x8xf32>, vector<8x8xf32> -> vector<8x8xf32>
    %95 = vector.shape_cast %78 : vector<8x1xf32> to vector<8x1xf32>
    %96 = vector.broadcast %95 : vector<8x1xf32> to vector<8x8xf32>
    %97 = vector.extract_strided_slice %9 {offsets = [0, 24], sizes = [8, 8], strides = [1, 1]} : vector<8x32xf32> to vector<8x8xf32>
    %98 = vector.extract_strided_slice %7 {offsets = [0, 24], sizes = [32, 8], strides = [1, 1]} : vector<32x32xf32> to vector<32x8xf32>
    %99 = vector.extract_strided_slice %8 {offsets = [0, 24], sizes = [32, 8], strides = [1, 1]} : vector<32x32xf32> to vector<32x8xf32>
    %cst_53 = arith.constant dense<0.000000e+00> : vector<8x32xf32>
    %100 = tpu.matmul %97, %98, %cst_53 {dimension_numbers = #tpu.dot_dimension_numbers<[1], [1], [0], [0], [0, 0, 1, 0], [], []>} : vector<8x8xf32>, vector<32x8xf32>, vector<8x32xf32> -> vector<8x32xf32>
    %c3 = arith.constant 3 : index
    %c0_54 = arith.constant 0 : index
    %c0_55 = arith.constant 0 : index
    %101 = vector.load %arg12[%c3, %c0_54, %c0_55] : memref<4x8x1xf32, #tpu.memory_space<vmem>>, vector<1x8x1xf32>
    %102 = vector.shape_cast %101 : vector<1x8x1xf32> to vector<8x1xf32>
    %cst_56 = arith.constant dense<0xFF800000> : vector<8xf32>
    %103 = vector.multi_reduction <maximumf>, %100, %cst_56 [1] : vector<8x32xf32> to vector<8xf32>
    %104 = vector.shape_cast %103 : vector<8xf32> to vector<8x1xf32>
    %105 = arith.maximumf %102, %104 : vector<8x1xf32>
    %106 = arith.subf %102, %105 : vector<8x1xf32>
    %107 = math.exp %106 : vector<8x1xf32>
    %108 = vector.broadcast %105 : vector<8x1xf32> to vector<8x32xf32>
    %109 = arith.subf %100, %108 : vector<8x32xf32>
    %110 = math.exp %109 : vector<8x32xf32>
    %c3_57 = arith.constant 3 : index
    %c0_58 = arith.constant 0 : index
    %c0_59 = arith.constant 0 : index
    %111 = vector.load %arg13[%c3_57, %c0_58, %c0_59] : memref<4x8x1xf32, #tpu.memory_space<vmem>>, vector<1x8x1xf32>
    %112 = vector.shape_cast %111 : vector<1x8x1xf32> to vector<8x1xf32>
    %113 = arith.mulf %107, %112 : vector<8x1xf32>
    %cst_60 = arith.constant dense<0.000000e+00> : vector<8xf32>
    %114 = vector.multi_reduction <add>, %110, %cst_60 [1] : vector<8x32xf32> to vector<8xf32>
    %115 = vector.shape_cast %114 : vector<8xf32> to vector<8x1xf32>
    %116 = arith.addf %113, %115 : vector<8x1xf32>
    %c3_61 = arith.constant 3 : index
    %c0_62 = arith.constant 0 : index
    %c0_63 = arith.constant 0 : index
    %117 = vector.load %arg13[%c3_61, %c0_62, %c0_63] : memref<4x8x1xf32, #tpu.memory_space<vmem>>, vector<1x8x1xf32>
    %118 = vector.shape_cast %117 : vector<1x8x1xf32> to vector<8x1xf32>
    %119 = vector.shape_cast %116 : vector<8x1xf32> to vector<1x8x1xf32>
    tpu.vector_store %arg13[%c3_61, %c0_62, %c0_63], %119 {strides = array<i32>} : memref<4x8x1xf32, #tpu.memory_space<vmem>>, vector<1x8x1xf32>,
    %c3_64 = arith.constant 3 : index
    %c0_65 = arith.constant 0 : index
    %c0_66 = arith.constant 0 : index
    %120 = vector.load %arg12[%c3_64, %c0_65, %c0_66] : memref<4x8x1xf32, #tpu.memory_space<vmem>>, vector<1x8x1xf32>
    %121 = vector.shape_cast %120 : vector<1x8x1xf32> to vector<8x1xf32>
    %122 = vector.shape_cast %105 : vector<8x1xf32> to vector<1x8x1xf32>
    tpu.vector_store %arg12[%c3_64, %c0_65, %c0_66], %122 {strides = array<i32>} : memref<4x8x1xf32, #tpu.memory_space<vmem>>, vector<1x8x1xf32>,
    %cst_67 = arith.constant dense<0.000000e+00> : vector<8x8xf32>
    %123 = tpu.matmul %110, %99, %cst_67 {dimension_numbers = #tpu.dot_dimension_numbers<[1], [0], [0], [1], [0, 0, 1, 1], [], []>} : vector<8x32xf32>, vector<32x8xf32>, vector<8x8xf32> -> vector<8x8xf32>
    %124 = vector.shape_cast %107 : vector<8x1xf32> to vector<8x1xf32>
    %125 = vector.broadcast %124 : vector<8x1xf32> to vector<8x8xf32>
    %126 = tpu.concatenate %38, %67, %96, %125 in 1 : vector<8x8xf32>, vector<8x8xf32>, vector<8x8xf32>, vector<8x8xf32> -> vector<8x32xf32>
    %127 = tpu.concatenate %36, %65, %94, %123 in 1 : vector<8x8xf32>, vector<8x8xf32>, vector<8x8xf32>, vector<8x8xf32> -> vector<8x32xf32>
    %c0_68 = arith.constant 0 : index
    %c0_69 = arith.constant 0 : index
    %128 = vector.load %arg14[%c0_68, %c0_69] : memref<8x32xf32, #tpu.memory_space<vmem>>, vector<8x32xf32>
    %129 = arith.mulf %126, %128 : vector<8x32xf32>
    %130 = arith.addf %129, %127 : vector<8x32xf32>
    %c0_70 = arith.constant 0 : index
    %c0_71 = arith.constant 0 : index
    %131 = vector.load %arg14[%c0_70, %c0_71] : memref<8x32xf32, #tpu.memory_space<vmem>>, vector<8x32xf32>
    tpu.vector_store %arg14[%c0_70, %c0_71], %130 {strides = array<i32>} : memref<8x32xf32, #tpu.memory_space<vmem>>, vector<8x32xf32>,
    %c0_i32_72 = arith.constant 0 : i32
    %132 = arith.cmpi eq, %arg2, %c0_i32_72 : i32
    %133 = arith.extui %132 : i1 to i32
    %c0_i32_73 = arith.constant 0 : i32
    %134 = arith.cmpi ne, %133, %c0_i32_73 : i32
    scf.if %134 {
      %c0_74 = arith.constant 0 : index
      %c0_75 = arith.constant 0 : index
      %c0_76 = arith.constant 0 : index
      %135 = vector.load %arg13[%c0_74, %c0_75, %c0_76] : memref<4x8x1xf32, #tpu.memory_space<vmem>>, vector<1x8x1xf32>
      %136 = vector.shape_cast %135 : vector<1x8x1xf32> to vector<8x1xf32>
      %cst_77 = arith.constant 1.000000e+00 : f32
      %137 = vector.broadcast %cst_77 : f32 to vector<8x1xf32>
      %138 = arith.divf %137, %136 : vector<8x1xf32>
      %139 = vector.shape_cast %138 : vector<8x1xf32> to vector<8x1xf32>
      %140 = vector.broadcast %139 : vector<8x1xf32> to vector<8x8xf32>
      %c1_78 = arith.constant 1 : index
      %c0_79 = arith.constant 0 : index
      %c0_80 = arith.constant 0 : index
      %141 = vector.load %arg13[%c1_78, %c0_79, %c0_80] : memref<4x8x1xf32, #tpu.memory_space<vmem>>, vector<1x8x1xf32>
      %142 = vector.shape_cast %141 : vector<1x8x1xf32> to vector<8x1xf32>
      %cst_81 = arith.constant 1.000000e+00 : f32
      %143 = vector.broadcast %cst_81 : f32 to vector<8x1xf32>
      %144 = arith.divf %143, %142 : vector<8x1xf32>
      %145 = vector.shape_cast %144 : vector<8x1xf32> to vector<8x1xf32>
      %146 = vector.broadcast %145 : vector<8x1xf32> to vector<8x8xf32>
      %c2_82 = arith.constant 2 : index
      %c0_83 = arith.constant 0 : index
      %c0_84 = arith.constant 0 : index
      %147 = vector.load %arg13[%c2_82, %c0_83, %c0_84] : memref<4x8x1xf32, #tpu.memory_space<vmem>>, vector<1x8x1xf32>
      %148 = vector.shape_cast %147 : vector<1x8x1xf32> to vector<8x1xf32>
      %cst_85 = arith.constant 1.000000e+00 : f32
      %149 = vector.broadcast %cst_85 : f32 to vector<8x1xf32>
      %150 = arith.divf %149, %148 : vector<8x1xf32>
      %151 = vector.shape_cast %150 : vector<8x1xf32> to vector<8x1xf32>
      %152 = vector.broadcast %151 : vector<8x1xf32> to vector<8x8xf32>
      %c3_86 = arith.constant 3 : index
      %c0_87 = arith.constant 0 : index
      %c0_88 = arith.constant 0 : index
      %153 = vector.load %arg13[%c3_86, %c0_87, %c0_88] : memref<4x8x1xf32, #tpu.memory_space<vmem>>, vector<1x8x1xf32>
      %154 = vector.shape_cast %153 : vector<1x8x1xf32> to vector<8x1xf32>
      %cst_89 = arith.constant 1.000000e+00 : f32
      %155 = vector.broadcast %cst_89 : f32 to vector<8x1xf32>
      %156 = arith.divf %155, %154 : vector<8x1xf32>
      %157 = vector.shape_cast %156 : vector<8x1xf32> to vector<8x1xf32>
      %158 = vector.broadcast %157 : vector<8x1xf32> to vector<8x8xf32>
      %159 = tpu.concatenate %140, %146, %152, %158 in 1 : vector<8x8xf32>, vector<8x8xf32>, vector<8x8xf32>, vector<8x8xf32> -> vector<8x32xf32>
      %c0_90 = arith.constant 0 : index
      %c0_91 = arith.constant 0 : index
      %160 = vector.load %arg14[%c0_90, %c0_91] : memref<8x32xf32, #tpu.memory_space<vmem>>, vector<8x32xf32>
      %161 = arith.mulf %160, %159 : vector<8x32xf32>
      %c0_92 = arith.constant 0 : index
      %c0_93 = arith.constant 0 : index
      %162 = vector.load %arg7[%c0_92, %c0_93] : memref<32x32xf32, #tpu.memory_space<vmem>>, vector<32x32xf32>
      %cst_94 = arith.constant dense<0.000000e+00> : vector<8x32xf32>
      %163 = tpu.matmul %161, %162, %cst_94 {dimension_numbers = #tpu.dot_dimension_numbers<[1], [0], [0], [1], [0, 0, 1, 1], [], []>} : vector<8x32xf32>, vector<32x32xf32>, vector<8x32xf32> -> vector<8x32xf32>
      %c0_95 = arith.constant 0 : index
      %c0_96 = arith.constant 0 : index
      %c0_97 = arith.constant 0 : index
      %164 = vector.load %arg3[%c0_95, %c0_96, %c0_97] : memref<1x8x32xf32, #tpu.memory_space<vmem>>, vector<1x8x32xf32>
      %165 = vector.shape_cast %164 : vector<1x8x32xf32> to vector<8x32xf32>
      %166 = arith.addf %163, %165 : vector<8x32xf32>
      %cst_98 = arith.constant dense<0.000000e+00> : vector<8xf32>
      %167 = vector.multi_reduction <add>, %166, %cst_98 [1] : vector<8x32xf32> to vector<8xf32>
      %168 = vector.shape_cast %167 : vector<8xf32> to vector<8x1xf32>
      %cst_99 = arith.constant 3.200000e+01 : f32
      %169 = vector.broadcast %cst_99 : f32 to vector<8x1xf32>
      %170 = arith.divf %168, %169 : vector<8x1xf32>
      %171 = vector.broadcast %170 : vector<8x1xf32> to vector<8x32xf32>
      %172 = arith.subf %166, %171 : vector<8x32xf32>
      %173 = arith.mulf %172, %172 : vector<8x32xf32>
      %cst_100 = arith.constant dense<0.000000e+00> : vector<8xf32>
      %174 = vector.multi_reduction <add>, %173, %cst_100 [1] : vector<8x32xf32> to vector<8xf32>
      %175 = vector.shape_cast %174 : vector<8xf32> to vector<8x1xf32>
      %cst_101 = arith.constant 3.200000e+01 : f32
      %176 = vector.broadcast %cst_101 : f32 to vector<8x1xf32>
      %177 = arith.divf %175, %176 : vector<8x1xf32>
      %178 = vector.broadcast %170 : vector<8x1xf32> to vector<8x32xf32>
      %179 = arith.subf %166, %178 : vector<8x32xf32>
      %cst_102 = arith.constant 9.99999997E-7 : f32
      %180 = vector.broadcast %cst_102 : f32 to vector<8x1xf32>
      %181 = arith.addf %177, %180 : vector<8x1xf32>
      %182 = math.rsqrt %181 : vector<8x1xf32>
      %183 = vector.broadcast %182 : vector<8x1xf32> to vector<8x32xf32>
      %184 = arith.mulf %179, %183 : vector<8x32xf32>
      %c0_103 = arith.constant 0 : index
      %c0_104 = arith.constant 0 : index
      %185 = vector.load %arg8[%c0_103, %c0_104] : memref<1x32xf32, #tpu.memory_space<vmem>>, vector<1x32xf32>
      %186 = vector.broadcast %185 : vector<1x32xf32> to vector<8x32xf32>
      %187 = arith.mulf %184, %186 : vector<8x32xf32>
      %c0_105 = arith.constant 0 : index
      %c0_106 = arith.constant 0 : index
      %188 = vector.load %arg9[%c0_105, %c0_106] : memref<1x32xf32, #tpu.memory_space<vmem>>, vector<1x32xf32>
      %189 = vector.broadcast %188 : vector<1x32xf32> to vector<8x32xf32>
      %190 = arith.addf %187, %189 : vector<8x32xf32>
      %c0_107 = arith.constant 0 : index
      %c0_108 = arith.constant 0 : index
      %c0_109 = arith.constant 0 : index
      %191 = vector.load %arg10[%c0_107, %c0_108, %c0_109] : memref<1x8x32xf32, #tpu.memory_space<vmem>>, vector<1x8x32xf32>
      %192 = vector.shape_cast %191 : vector<1x8x32xf32> to vector<8x32xf32>
      %193 = vector.shape_cast %190 : vector<8x32xf32> to vector<1x8x32xf32>
      tpu.vector_store %arg10[%c0_107, %c0_108, %c0_109], %193 {strides = array<i32>} : memref<1x8x32xf32, #tpu.memory_space<vmem>>, vector<1x8x32xf32>,
    } else {
    }
    return
  }
  func.func @transform_0(%arg0: i32, %arg1: i32, %arg2: i32) -> (i32, i32, i32) {
    %c0_i32 = arith.constant 0 : i32
    %c0_i32_0 = arith.constant 0 : i32
    return %arg0, %arg1, %c0_i32 : i32, i32, i32
  }
  func.func @transform_1(%arg0: i32, %arg1: i32, %arg2: i32) -> (i32, i32, i32) {
    %c0_i32 = arith.constant 0 : i32
    %c0_i32_0 = arith.constant 0 : i32
    return %arg0, %arg2, %c0_i32 : i32, i32, i32
  }
  func.func @transform_2(%arg0: i32, %arg1: i32, %arg2: i32) -> (i32, i32) {
    %c0_i32 = arith.constant 0 : i32
    %c0_i32_0 = arith.constant 0 : i32
    %c0_i32_1 = arith.constant 0 : i32
    return %c0_i32, %c0_i32_0 : i32, i32
  }
  func.func @transform_3(%arg0: i32, %arg1: i32, %arg2: i32) -> (i32, i32) {
    %c0_i32 = arith.constant 0 : i32
    %c0_i32_0 = arith.constant 0 : i32
    %c0_i32_1 = arith.constant 0 : i32
    return %c0_i32, %c0_i32_0 : i32, i32
  }
  func.func @transform_4(%arg0: i32, %arg1: i32, %arg2: i32) -> (i32, i32) {
    %c0_i32 = arith.constant 0 : i32
    %c0_i32_0 = arith.constant 0 : i32
    %c0_i32_1 = arith.constant 0 : i32
    return %c0_i32, %c0_i32_0 : i32, i32
  }
  func.func @transform_5(%arg0: i32, %arg1: i32, %arg2: i32) -> (i32, i32) {
    %c0_i32 = arith.constant 0 : i32
    %c0_i32_0 = arith.constant 0 : i32
    %c0_i32_1 = arith.constant 0 : i32
    return %c0_i32, %c0_i32_0 : i32, i32
  }
  func.func @transform_6(%arg0: i32, %arg1: i32, %arg2: i32) -> (i32, i32) {
    %c0_i32 = arith.constant 0 : i32
    %c0_i32_0 = arith.constant 0 : i32
    %c0_i32_1 = arith.constant 0 : i32
    return %c0_i32, %c0_i32_0 : i32, i32
  }
  func.func @transform_7(%arg0: i32, %arg1: i32, %arg2: i32) -> (i32, i32, i32) {
    %c0_i32 = arith.constant 0 : i32
    %c0_i32_0 = arith.constant 0 : i32
    return %arg0, %arg1, %c0_i32 : i32, i32, i32
  }
}

</mosaic_0001>

<bundles_post_ra>
// kernel: tpu_custom_call.1
= control target key start
LH: loop header
LB: loop body
LE: loop exit
PB: predicated region body
PF: predicated region fallthrough
CT: control target
= control target key end

     0   :  { %s2883_s0 = inlined_call_operand.hbm [shape: f32[2,8,32], index: 0, kind: input, shape index: {}]   ;;  %s2884_s1 = inlined_call_operand.hbm [shape: f32[2,32,32], index: 1, kind: input, shape index: {}]   ;;  %s2885_s2 = inlined_call_operand.hbm [shape: f32[32,32], index: 2, kind: input, shape index: {}]   ;;  %s2886_s3 = inlined_call_operand.hbm [shape: f32[32,64], index: 3, kind: input, shape index: {}]   ;;  %s2887_s4 = inlined_call_operand.hbm [shape: f32[32,32], index: 4, kind: input, shape index: {}]   ;;  %s2888_s5 = inlined_call_operand.vmem [shape: f32[1,32], index: 5, kind: input, shape index: {}]   ;;  %s2889_s6 = inlined_call_operand.vmem [shape: f32[1,32], index: 6, kind: input, shape index: {}]   ;;  %s2890_s7 = inlined_call_operand.hbm [shape: f32[2,8,32], index: 7, kind: output, shape index: {}]  }
   0x1   :  { %2896 = sst [smem:[#allocation24_spill]] %s2883_s0 }
   0x2   :  { %2897 = sst [smem:[#allocation25_spill]] %s2885_s2 }
   0x3   :  { %2898 = sst [smem:[#allocation26_spill]] %s2886_s3 }
   0x4   :  { %2899 = sst [smem:[#allocation27_spill]] %s2887_s4 }
   0x5   :  { %12 = vsyncpa [#allocation7], 0 }
   0x6   :  { %14 = vsyncpa [#allocation7 + $0x1], 0 }
   0x7   :  { %15 = vsyncpa [#allocation10], 0 }
   0x8   :  { %17 = vsyncpa [#allocation10 + $0x1], 0 }
   0x9   :  { %18 = vsyncpa [#allocation13], 0 }
   0xa   :  { %19 = vsyncpa [#allocation8], 0 }
   0xb   :  { %21 = vsyncpa [#allocation8 + $0x1], 0  ;;  %s2421_s24 = smov 0   ;;  %s2423_s25 = smov 0  }
   0xc   :  { %s2425_s26 = smov 0   ;;  %s2427_s27 = smov 0  }
   0xd   :  { %s2429_s28 = smov 0   ;;  %s2431_s29 = smov 0  }
   0xe LB: > { %2900 = sst [smem:[#allocation21_spill]] %s2353_s28  ;;  %s2452_s30 = sadd.s32 4294967295, %s2357_s29   ;;  %s2357_s29 = sphi %s2431_s29, %s27_s29   ;;  %s2353_s28 = sphi %s2429_s28, %s2922_s28   ;;  %s2349_s27 = sphi %s2427_s27, %s2921_s27   ;;  %s2345_s26 = sphi %s2425_s26, %s2925_s26   ;;  %s2341_s25 = sphi %s2423_s25, %s2924_s25   ;;  %s2337_s24 = sphi %s2421_s24, %s2923_s24  }
   0xf   : > { %s1752_s8 = sadd.s32 4294967294, %s2357_s29   ;;  %p68_p0 = scmp.ne.s32.totalorder %s2341_s25, %s2337_s24 }
  0x10   : > { %p2891_p1 = scmp.eq.s32.totalorder %s2452_s30, 0  ;;  %p227_p2 = scmp.eq.s32.totalorder %s2452_s30, 1 }
  0x11   : > { %p233_p3 = scmp.eq.s32.totalorder %s1752_s8, 1  ;;  %p1753_p5 = scmp.ge.s32.totalorder %s2357_s29, 1 }
  0x12   : > { %p2461_p4 = por %p2891_p1, %p68_p0  ;;  %p240_p7 = scmp.lt.s32.totalorder %s2357_s29, 3 }
  0x13   : > { %p2466_p6 = por %p233_p3, %p68_p0  ;;  %s2359_s12 = smov [#allocation11]  }
  0x14   : > { %p2471_p8 = pnand %p1753_p5, %p240_p7  ;;  %s252_s13 = sshll.u32 %s2359_s12, 4  ;;  %s253_s13 = int_to_ptr.vmem [resolvable:$true] %s252_s13 }
  0x15   : > { %s2360_s15 = smov [#allocation12]   ;;  %s2361_s17 = smov [#allocation14]  }
  0x16   : > { %p2007_p9 = pneg %p2471_p8  ;;  %s265_s16 = sshll.u32 %s2360_s15, 4  ;;  %s266_s16 = int_to_ptr.vmem [resolvable:$true] %s265_s16 }
  0x17   : > { %s278_s18 = sshll.u32 %s2361_s17, 4  ;;  %s2142_s19 = scalar_lea.vmem %s253_s13, 512  ;;  %s279_s18 = int_to_ptr.vmem [resolvable:$true] %s278_s18 }
  0x18   : > { %p2480_p11 = pnand %p2007_p9, %p2891_p1  ;;  %p2143_p13 = scmp.ne.s32.totalorder %s253_s13, %s2142_s19 }
  0x19   : > { %p2150_p5 = scmp.lt.s32.totalorder %s253_s13, %s253_s13  ;;  %p2151_p7 = scmp.lt.s32.totalorder %s2142_s19, %s2142_s19 }
  0x1a   : > { %p2133_p12 = pneg %p2480_p11 }
  0x1b   : > { %p2152_p9 = por %p2151_p7, %p2150_p5 }
  0x1c   : > { %p2145_p0 = pnand %p2143_p13, %p2133_p12 }
  0x1e   : > { %p2146_p3 = pneg %p2145_p0 }
  0x20   : > { %p2153_p10 = pnand %p2152_p9, %p2146_p3 }
  0x22   : > { %2156 = shalt.err (!%p2153_p10)
}
  0x23   : > { %s2892_s20 = smov 128   ;;  %s2893_s21 = smov 8  }
  0x24   : > { %s2905_s2 = sld [smem:[#allocation25_spill]]  ;;  %s2168_s8 = scalar_lea.vmem %s266_s16, 512 }
  0x25   : > { %p2169_p13 = scmp.ne.s32.totalorder %s266_s16, %s2168_s8  ;;  %p2176_p3 = scmp.lt.s32.totalorder %s266_s16, %s266_s16 }
  0x26   : > { %p2177_p10 = scmp.lt.s32.totalorder %s2168_s8, %s2168_s8 }
  0x27   : > { %p2171_p0 = pnand %p2169_p13, %p2133_p12 }
  0x28   : > { %p2178_p7 = por %p2177_p10, %p2176_p3 }
  0x29   : > { %p2172_p5 = pneg %p2171_p0 }
  0x2a   : > { %2010 = dma.hbm_to_vmem [thread:$0]  (!%p2480_p11), %s2905_s2, 512, %s253_s13, [#allocation10], %s2892_s20, %s2892_s20, %s2893_s21  }
  0x2b   : > { %p2179_p9 = pnand %p2178_p7, %p2172_p5 }
  0x2d   : > { %2182 = shalt.err (!%p2179_p9)
}
  0x2e   : > { %s2906_s3 = sld [smem:[#allocation26_spill]]  ;;  %s2194_s13 = scalar_lea.vmem %s279_s18, 512 }
  0x2f   : > { %p2195_p1 = scmp.ne.s32.totalorder %s279_s18, %s2194_s13  ;;  %p2202_p3 = scmp.lt.s32.totalorder %s279_s18, %s279_s18 }
  0x30   : > { %p2203_p5 = scmp.lt.s32.totalorder %s2194_s13, %s2194_s13 }
  0x31   : > { %p2197_p13 = pnand %p2195_p1, %p2133_p12 }
  0x32   : > { %p2204_p10 = por %p2203_p5, %p2202_p3 }
  0x33   : > { %p2198_p0 = pneg %p2197_p13 }
  0x34   : > { %2013 = dma.hbm_to_vmem [thread:$0]  (!%p2480_p11), %s2906_s3, 512, %s266_s16, [#allocation13], %s2892_s20, %s2892_s20, %s2893_s21  }
  0x35   : > { %p2205_p7 = pnand %p2204_p10, %p2198_p0 }
  0x37   : > { %2208 = shalt.err (!%p2205_p7)
}
  0x38   : > { %s2907_s4 = sld [smem:[#allocation27_spill]]  ;;  %s55_s16 = sadd.s32 1, %s2345_s26 }
  0x39   : > { %s46_s14 = sadd.s32 1, %s2353_s28  ;;  %p62_p1 = scmp.ne.s32.totalorder %s2345_s26, %s2341_s25 }
  0x3a   : > { %p48_p12 = scmp.ge.s32.totalorder %s46_s14, 2  ;;  %p63_p9 = scmp.eq.s32.totalorder %s2357_s29, 0 }
  0x3b   : > { %p2526_p13 = por %p227_p2, %p62_p1  ;;  %p2031_p0 = scmp.lt.s32.totalorder %s2357_s29, 2 }
  0x3c   : > { %s2927_s14 = smov (%p48_p12, %s46_s14), 0  ;;  %p64_p3 = por %p63_p9, %p62_p1 }
  0x3d   : > { %2909 = sst [smem:[#allocation22_spill]] %s2927_s14  ;;  %s2534_s23 = sand.u32 1, %s2345_s26  }
  0x3e   : > { %2016 = dma.hbm_to_vmem [thread:$0]  (!%p2480_p11), %s2907_s4, 512, %s279_s18, [#allocation13], %s2892_s20, %s2892_s20, %s2893_s21  }
  0x3f   : > { %s50_s18 = ssub.s32 %s2353_s28, %s2927_s14  ;;  %s1758_s8 = sshll.u32 %s2534_s23, 3 }
  0x40   : > { %p53_p11 = scmp.eq.s32.totalorder %s50_s18, 0  ;;  %s1759_s12 = sshll.u32 %s2353_s28, 7 }
  0x41   : > { %s2911_s0 = sld [smem:[#allocation24_spill]]  ;;  %s302_s20 = scalar_lea.vmem [#allocation6], %s1758_s8 }
  0x42   : > { %s2541_s15 = scalar_select %p53_p11, %s2345_s26, %s55_s16  }
  0x43   : > { %s310_s21 = sshll.u32 %s302_s20, 4  ;;  %p2548_p2 = pnand %p2031_p0, %p64_p3  ;;  %s311_s21 = int_to_ptr.vmem [resolvable:$true] %s310_s21 }
  0x44   : > { %2910 = sst [smem:[#allocation23_spill]] %s2541_s15  ;;  %s1760_s3 = sshll.u32 %s2534_s23, 5 }
  0x45   : > { %s1806_s18 = sshll.u32 %s2353_s28, 9  ;;  %s299_s4 = scalar_lea.sflag [#allocation7], %s2534_s23 }
  0x46   : > { %p2211_p5 = pneg %p2548_p2  ;;  %s2222_s16 = scalar_lea.vmem %s311_s21, 128 }
  0x47   : > { %s308_s19 = scalar_lea.hbm %s2911_s0, %s1759_s12  ;;  %p2223_p10 = scmp.ne.s32.totalorder %s311_s21, %s2222_s16 }
  0x48   : > { %s2364_s20 = smov [#allocation6]  }
  0x49   : > { %p2225_p7 = pnand %p2223_p10, %p2211_p5  ;;  %s2227_s8 = sshll.u32 %s2364_s20, 4  ;;  %s2228_s8 = int_to_ptr.vmem [resolvable:$false] %s2227_s8 }
  0x4a   : > { %s2229_s12 = scalar_lea.vmem %s2228_s8, 256  ;;  %p2230_p12 = scmp.lt.s32.totalorder %s311_s21, %s2228_s8 }
  0x4b   : > { %p2226_p1 = pneg %p2225_p7  ;;  %p2231_p9 = scmp.lt.s32.totalorder %s2229_s12, %s2222_s16 }
  0x4d   : > { %p2232_p0 = por %p2231_p9, %p2230_p12 }
  0x4f   : > { %p2233_p3 = pnand %p2232_p0, %p2226_p1 }
  0x51   : > { %2236 = shalt.err (!%p2233_p3)
}
  0x52   : > { %2020 = dma.hbm_to_vmem [thread:$0]  (!%p2548_p2), %s308_s19, 128, %s311_s21, %s299_s4  }
  0x53   : > { %s321_s23 = scalar_lea.vmem [#allocation9], %s1760_s3  ;;  %s317_s17 = sand.u32 1, %s2357_s29  }
  0x54   : > { %s330_s13 = sshll.u32 %s321_s23, 4  ;;  %s329_s20 = scalar_lea.hbm %s2884_s1, %s1806_s18  ;;  %s331_s13 = int_to_ptr.vmem [resolvable:$true] %s330_s13 }
  0x55   : > { %s318_s28 = scalar_lea.sflag [#allocation10], %s317_s17  ;;  %s2250_s15 = scalar_lea.vmem %s331_s13, 512 }
  0x56   : > { %p2251_p11 = scmp.ne.s32.totalorder %s331_s13, %s2250_s15  ;;  %s2365_s16 = smov [#allocation9]  }
  0x57   : > { %s2255_s8 = sshll.u32 %s2365_s16, 4  ;;  %s2256_s8 = int_to_ptr.vmem [resolvable:$false] %s2255_s8 }
  0x58   : > { %p2253_p10 = pnand %p2251_p11, %p2211_p5  ;;  %s2257_s12 = scalar_lea.vmem %s2256_s8, 1024 }
  0x59   : > { %p2258_p1 = scmp.lt.s32.totalorder %s331_s13, %s2256_s8  ;;  %p2259_p12 = scmp.lt.s32.totalorder %s2257_s12, %s2250_s15 }
  0x5a   : > { %p2254_p7 = pneg %p2253_p10 }
  0x5b   : > { %p2260_p9 = por %p2259_p12, %p2258_p1 }
  0x5d   : > { %p2261_p0 = pnand %p2260_p9, %p2254_p7 }
  0x5f   : > { %2264 = shalt.err (!%p2261_p0)
}
  0x60   : > { %s2913_s0 = smov 8   ;;  %s2914_s3 = smov 128  }
  0x61   : > { %2023 = dma.hbm_to_vmem [thread:$0]  (!%p2548_p2), %s329_s20, 512, %s331_s13, %s318_s28, %s2914_s3, %s2914_s3, %s2913_s0  }
  0x62   : > { %342 = sbr.rel (%p2471_p8) target bundleno = 3134 (0xc3e), region = 48  ;;  %s2577_s4 = sand.u32 (!%p2471_p8), 1, %s2341_s25  }
  0x63   : > { %s1764_s21 = sshll.u32 (!%p2471_p8), %s2577_s4, 3  ;;  %s345_s14 = scalar_lea.sflag (!%p2471_p8), [#allocation7], %s2577_s4 }
  0x64   : > { %s2583_s15 = scalar_lea.vmem (!%p2471_p8), [#allocation6], %s1764_s21 }
  0x67   : > { %2316 = dma.done.wait (%p2461_p4), %s345_s14, 128  }
  0x68   : > { %2318 = vsyncadd (%p2461_p4), %s345_s14, 4294967168  ;;  %s353_s2 = sand.u32 1, %s2452_s30   ;;  %s1765_s28 = sshll.u32 %s2577_s4, 5 }
  0x69   : > { %s354_s11 = scalar_lea.sflag [#allocation10], %s353_s2  ;;  %s2591_s19 = scalar_lea.vmem [#allocation9], %s1765_s28 }
  0x6a   : > { %2320 = dma.done.wait (%p2461_p4), %s354_s11, 512  }
  0x6b   : > { %2322 = vsyncadd (%p2461_p4), %s354_s11, 4294966784  ;;  %p2915_p8 = scmp.eq.s32.totalorder %s2452_s30, 0 }
  0x6d   : > { %2324 = dma.done.wait (%p2915_p8), [#allocation10], 512   ;;  %p2916_p2 = pmov %p2915_p8 }
  0x6f   : > { %2326 = vsyncadd (%p2916_p2), [#allocation10], 4294966784  ;;  %p2917_p5 = pmov %p2916_p2 }
  0x70   : > { %p2918_p3 = pmov %p2916_p2 }
  0x71   : > { %2328 = dma.done.wait (%p2917_p5), [#allocation13], 1024  }
  0x72   : > { %2330 = vsyncadd (%p2918_p3), [#allocation13], 4294966272  ;;  %vm415_vm0 = vcmask 261120   ;;  %v2366_v0 = vmov 0.0   ;;  %vm2367_vm1 = vmmov 0   ;;  %v507_v1 = vld [vmem:[#allocation12 + $0x18] sm:$0xff] }
  0x73   : > { %1865 = vmatprep.subr.mxu0 %v2366_v0  ;;  %499 = vst.msk [vmem:[#allocation5] sm:$0xff] %vm415_vm0, %v2366_v0  ;;  %1873 = vmatprep.mubr.msk.f32.mxu0 %vm2367_vm1, %v2366_v0  ;;  %v506_v2 = vld [vmem:[#allocation12 + $0x10] sm:$0xff]  ;;  %v500_v3 = vld [vmem:[%s2591_s19] sm:$0xff]  ;;  %v505_v4 = vld [vmem:[#allocation12 + $0x8] sm:$0xff]  ;;  %vm607_vm2 = vcmask 64512   ;;  %s2368_s30 = smov 96  }
  0x74   : > { %1876 = vmatprep.subr.mxu1 %v507_v1  ;;  %1884 = vmatprep.mubr.msk.f32.mxu1 %vm415_vm0, %v500_v3  ;;  %v414_v5 = vld [vmem:[#allocation11 + $0x18] sm:$0xff]  ;;  %v413_v6 = vld [vmem:[#allocation11 + $0x10] sm:$0xff]  ;;  %v504_v7 = vld [vmem:[#allocation12] sm:$0xff]  ;;  %s2369_s9 = smov 120   ;;  %vm490_vm3 = vcmask 7168   ;;  %v2370_v21 = vmov -inf  }
  0x75   : > { %1877 = vmatpush3.msra.mxu1 %v507_v1  ;;  %1866 = vmatpush3.msra.mxu0 %v414_v5  ;;  %v412_v8 = vld [vmem:[#allocation11 + $0x8] sm:$0xff]  ;;  %v411_v10 = vld [vmem:[#allocation11] sm:$0xff]  ;;  %v502_v11 = vld [vmem:[%s2591_s19 + $0x10] sm:$0xff]  ;;  %491 = vst.msk [vmem:[#allocation3] sm:$0xff] %vm490_vm3, %v2370_v21  ;;  %v2371_v29 = vmov 0   ;;  %s2372_s18 = smov 112  }
  0x76   : > { %1878 = vmatprep.subr.mxu1 %v506_v2  ;;  %1867 = vmatprep.subr.mxu0 %v2366_v0  ;;  %v501_v9 = vld [vmem:[%s2591_s19 + $0x8] sm:$0xff]  ;;  %v2617_v12 = vld [vmem:[%s2583_s15] sm:$0xff]  ;;  %492 = vst.msk [vmem:[#allocation3 + $0x8] sm:$0xff] %vm490_vm3, %v2370_v21  ;;  %493 = vst.msk [vmem:[#allocation3 + $0x10] sm:$0xff] %vm490_vm3, %v2370_v21  ;;  %s2373_s23 = smov 88   ;;  %s2374_s13 = smov 104  }
  0x77   : > { %1879 = vmatpush3.msra.mxu1 %v506_v2  ;;  %1868 = vmatpush3.msra.mxu0 %v413_v6  ;;  %v503_v13 = vld [vmem:[%s2591_s19 + $0x18] sm:$0xff]  ;;  %494 = vst.msk [vmem:[#allocation3 + $0x18] sm:$0xff] %vm490_vm3, %v2370_v21  ;;  %495 = vst.msk [vmem:[#allocation4] sm:$0xff] %vm490_vm3, %v2366_v0  ;;  %s2375_s17 = smov 80   ;;  %s2376_s20 = smov 72   ;;  %vm1427_vm4 = vcmask 130048  }
  0x78   : > { %1880 = vmatprep.subr.mxu1 %v505_v4  ;;  %1869 = vmatprep.subr.mxu0 %v2366_v0  ;;  %496 = vst.msk [vmem:[#allocation4 + $0x8] sm:$0xff] %vm490_vm3, %v2366_v0  ;;  %497 = vst.msk [vmem:[#allocation4 + $0x10] sm:$0xff] %vm490_vm3, %v2366_v0  ;;  %s2377_s16 = smov 8   ;;  %s2378_s8 = smov 16   ;;  %vm1429_vm5 = vcmask 195584  }
  0x79   : > { %1881 = vmatpush3.msra.mxu1 %v505_v4  ;;  %1870 = vmatpush3.msra.mxu0 %v412_v8  ;;  %498 = vst.msk [vmem:[#allocation4 + $0x18] sm:$0xff] %vm490_vm3, %v2366_v0  ;;  %s2379_s12 = smov 24   ;;  %s1803_s2 = sshll.u32 %s2349_s27, 7 }
  0x7a   : > { %1882 = vmatprep.subr.mxu1 %v504_v7  ;;  %1871 = vmatprep.subr.mxu0 %v2366_v0  ;;  %s404_s28 = scalar_lea.vmem [#allocation15], %s1764_s21 }
  0x7b   : > { %1883 = vmatpush3.msra.mxu1 %v504_v7  ;;  %1872 = vmatpush3.msra.mxu0 %v411_v10  ;;  %s1614_s11 = sshll.u32 %s404_s28, 4  ;;  %s1615_s11 = int_to_ptr.vmem [resolvable:$true] %s1614_s11 }
  0x7c   : > { %1885 = vmatmul.mubr.msk.f32.vlgmr.msra.gmra.mxu1 %vm415_vm0, %v501_v9  ;;  %1874 = vmatmul.mubr.msk.f32.vlgmr.msra.gmra.mxu0 %vm415_vm0, %v2617_v12  ;;  %v2685_v30 = vld [vmem:[#allocation3] sm:$0xff] }
  0x7d   : > { %1887 = vmatprep.mubr.msk.f32.mxu1 %vm415_vm0, %v502_v11  ;;  %1890 = vmatprep.subr.mxu0 %v2366_v0  ;;  %v2716_v48 = vld [vmem:[#allocation3 + $0x8] sm:$0xff]  ;;  %v1105_v7 = vld [vmem:[#allocation3 + $0x10] sm:$0xff] }
  0x7e   : > { %1898 = vmatprep.mubr.msk.f32.mxu0 %vm2367_vm1, %v2366_v0  ;;  %1901 = vmatprep.subr.mxu1 %v2366_v0 }
  0x7f   : > { %2103 = vset.pattern.permute.xlu0 %v2371_v29  ;;  %2104 = vset.pattern.permute.xlu1 %v2371_v29 }
  0x80   : > { %1888 = vmatmul.mubr.msk.f32.gmra.mxu1 %vm415_vm0, %v503_v13 }
  0x81   : > { %1909 = vmatprep.mubr.msk.f32.mxu1 %vm2367_vm1, %v2366_v0 }
 0x13c   : > { %v2632_v14 = vpop.f32.mrf.mxu1  ;;  %v485_v15 = vpop.f32.mrf.mxu0 }
 0x13d   : > { %489 = vst.msk [vmem:[#allocation2] sm:$0xff] %vm415_vm0, %v485_v15 }
 0x13e   : > { %v2634_v16 = vpop.f32.mrf.mxu1  ;;  %v1875_v17 = vpop.f32.mrf.mxu0 }
 0x140   : > { %v2637_v18 = vpop.f32.mrf.mxu1 }
 0x141   : > { %724 = vrot.lane.b32.xlu1 %v2637_v18, %s2368_s30  ;;  %1891 = vmatpush3.xpose.msk.msra.mxu0 %vm607_vm2, %v2637_v18 }
 0x142   : > { %1892 = vmatprep.subr.mxu0 %v2366_v0  ;;  %v2643_v19 = vpop.f32.mrf.mxu1 }
 0x144   : > { %v2656_v20 = vld [vmem:[#allocation2] sm:$0xff] }
 0x145   : > { %722 = vrot.lane.b32.xlu1 %v2643_v19, %s2368_s30  ;;  %1893 = vmatpush3.xpose.msk.msra.mxu0 %vm607_vm2, %v2643_v19 }
 0x146   : > { %1894 = vmatprep.subr.mxu0 %v2366_v0 }
 0x149   : > { %720 = vrot.lane.b32.xlu1 %v2632_v14, %s2368_s30  ;;  %1895 = vmatpush3.xpose.msk.msra.mxu0 %vm607_vm2, %v2632_v14 }
 0x14a   : > { %1896 = vmatprep.subr.mxu0 %v2366_v0 }
 0x14d   : > { %718 = vrot.lane.b32.xlu1 %v2634_v16, %s2368_s30  ;;  %1897 = vmatpush3.xpose.msk.msra.mxu0 %vm607_vm2, %v2634_v16 }
 0x14e   : > { %1923 = vmatprep.subr.mxu0 %v2366_v0 }
 0x150   : > { %1899 = vmatmul.mubr.msk.f32.vlgmr.msra.gmra.mxu0 %vm607_vm2, %v2656_v20 }
 0x151   : > { %816 = vrot.lane.b32.xlu1 %v2637_v18, %s2369_s9  ;;  %1931 = vmatprep.mubr.msk.f32.mxu0 %vm2367_vm1, %v2366_v0 }
 0x155   : > { %814 = vrot.lane.b32.xlu1 %v2643_v19, %s2369_s9 }
 0x159   : > { %812 = vrot.lane.b32.xlu1 %v2632_v14, %s2369_s9 }
 0x15d   : > { %810 = vrot.lane.b32.xlu1 %v2634_v16, %s2369_s9 }
 0x161   : > { %808 = vrot.lane.b32.xlu1 %v2656_v20, %s2369_s9  ;;  %s1612_s9 = scalar_lea.hbm %s2890_s7, %s1803_s2 }
 0x1b3   : > { %v725_v22 = vpop.permute.xlu1 %724 }
 0x1b4   : > { %1902 = vmatpush3.msra.mxu1 %v725_v22 }
 0x1b5   : > { %1903 = vmatprep.subr.mxu1 %v2366_v0 }
 0x1b7   : > { %v723_v23 = vpop.permute.xlu1 %722 }
 0x1b8   : > { %1904 = vmatpush3.msra.mxu1 %v723_v23 }
 0x1b9   : > { %1905 = vmatprep.subr.mxu1 %v2366_v0 }
 0x1bb   : > { %v721_v24 = vpop.permute.xlu1 %720 }
 0x1bc   : > { %1906 = vmatpush3.msra.mxu1 %v721_v24 }
 0x1bd   : > { %1907 = vmatprep.subr.mxu1 %v2366_v0 }
 0x1bf   : > { %v719_v25 = vpop.permute.xlu1 %718 }
 0x1c0   : > { %1908 = vmatpush3.msra.mxu1 %v719_v25 }
 0x1c1   : > { %1912 = vmatprep.subr.mxu1 %v2366_v0 }
 0x1c3   : > { %v817_v37 = vpop.permute.xlu1 %816 }
 0x1c7   : > { %v815_v38 = vpop.permute.xlu1 %814 }
 0x1cb   : > { %v813_v40 = vpop.permute.xlu1 %812 }
 0x1cf   : > { %v811_v41 = vpop.permute.xlu1 %810 }
 0x1d3   : > { %v809_v42 = vpop.permute.xlu1 %808 }
 0x210   : > { %v689_v26 = vpop.f32.mrf.mxu0 }
 0x211   : > { %v694_v27 = vsel %vm415_vm0, %v689_v26, -inf }
 0x212   : > { %695 = vmax.xlane.f32.xlu0 %v694_v27  ;;  %v1900_v28 = vpop.f32.mrf.mxu0 }
 0x29b   : > { %v696_v31 = vpop.xlane.xlu0 %695 }
 0x29c   : > { %v2688_v32 = vmax.f32 %v2685_v30, %v696_v31 }
 0x29e   : > { %v698_v33 = vsub.f32 %v2685_v30, %v2688_v32  ;;  %717 = vst.msk [vmem:[#allocation3] sm:$0xff] %vm490_vm3, %v2688_v32  ;;  %703 = vperm.xlu0 %2103, %v2688_v32   ;;  %v709_v30 = vld [vmem:[#allocation4] sm:$0xff] }
 0x319   : > { %v704_v34 = vpop.permute.xlu0 %703 }
 0x31a   : > { %v706_v35 = vsub.f32 %v689_v26, %v704_v34 }
 0x31c   : > { %v707_v36 = vmul.f32 1.442695, %v706_v35 }
 0x31e   : > { %2105 = vpow2.f32 %v707_v36 }
 0x32b   : > { %v2695_v39 = vpop.eup %2105 }
 0x32c   : > { %1910 = vmatmul.mubr.msk.f32.vlgmr.msra.gmra.mxu1 %vm415_vm0, %v2695_v39 }
 0x32d   : > { %1913 = vmatpush3.xpose.msk.msra.mxu1 %vm607_vm2, %v817_v37  ;;  %1920 = vmatprep.mubr.msk.f32.mxu1 %vm2367_vm1, %v2366_v0 }
 0x32e   : > { %1914 = vmatprep.subr.mxu1 %v2366_v0 }
 0x331   : > { %1915 = vmatpush3.xpose.msk.msra.mxu1 %vm607_vm2, %v815_v38 }
 0x332   : > { %1916 = vmatprep.subr.mxu1 %v2366_v0 }
 0x335   : > { %1917 = vmatpush3.xpose.msk.msra.mxu1 %vm607_vm2, %v813_v40 }
 0x336   : > { %1918 = vmatprep.subr.mxu1 %v2366_v0 }
 0x339   : > { %1919 = vmatpush3.xpose.msk.msra.mxu1 %vm607_vm2, %v811_v41 }
 0x33a   : > { %1945 = vmatprep.subr.mxu1 %v2366_v0 }
 0x33c   : > { %1921 = vmatmul.mubr.msk.f32.vlgmr.msra.gmra.mxu1 %vm607_vm2, %v809_v42  ;;  %v1311_v42 = vld [vmem:[#allocation3 + $0x18] sm:$0xff] }
 0x33d   : > { %1953 = vmatprep.mubr.msk.f32.mxu1 %vm2367_vm1, %v2366_v0 }
 0x3ec   : > { %v2712_v43 = vpop.f32.mrf.mxu1 }
 0x3ee   : > { %v1911_v44 = vpop.f32.mrf.mxu1 }
 0x3fc   : > { %v894_v45 = vpop.f32.mrf.mxu1 }
 0x3fd   : > { %v900_v46 = vsel %vm415_vm0, %v894_v45, -inf }
 0x3fe   : > { %901 = vmax.xlane.f32.xlu1 %v900_v46  ;;  %v1922_v47 = vpop.f32.mrf.mxu1  ;;  %v916_v46 = vld [vmem:[#allocation4 + $0x8] sm:$0xff] }
 0x40f   : > { %1018 = vrot.lane.b32.xlu1 %v2632_v14, %s2372_s18 }
 0x487   : > { %v902_v49 = vpop.xlane.xlu1 %901 }
 0x488   : > { %v2719_v50 = vmax.f32 %v2716_v48, %v902_v49 }
 0x48a   : > { %v904_v51 = vsub.f32 %v2716_v48, %v2719_v50  ;;  %923 = vst.msk [vmem:[#allocation3 + $0x8] sm:$0xff] %vm490_vm3, %v2719_v50  ;;  %909 = vperm.xlu0 %2103, %v2719_v50  }
 0x48b   : > { %v1019_v62 = vpop.permute.xlu1 %1018 }
 0x48c   : > { %v905_v40 = vmul.f32 1.442695, %v904_v51 }
 0x48e   : > { %930 = vrot.lane.b32.xlu0 %v2637_v18, %s2373_s23 }
 0x492   : > { %928 = vrot.lane.b32.xlu0 %v2643_v19, %s2373_s23 }
 0x496   : > { %926 = vrot.lane.b32.xlu0 %v2632_v14, %s2373_s23 }
 0x49a   : > { %924 = vrot.lane.b32.xlu0 %v2634_v16, %s2373_s23  ;;  %s2265_s23 = scalar_lea.vmem %s1615_s11, 128 }
 0x49b   : > { %p2266_p4 = scmp.ne.s32.totalorder %s1615_s11, %s2265_s23 }
 0x49d   : > { %p2267_p11 = pnand %p2266_p4, %p2526_p13 }
 0x49e   : > { %1022 = vrot.lane.b32.xlu0 %v2637_v18, %s2372_s18 }
 0x49f   : > { %p2268_p10 = pneg %p2267_p11 }
 0x4a2   : > { %1020 = vrot.lane.b32.xlu0 %v2643_v19, %s2372_s18 }
 0x4a6   : > { %1016 = vrot.lane.b32.xlu0 %v2634_v16, %s2372_s18 }
 0x4aa   : > { %1014 = vrot.lane.b32.xlu0 %v2656_v20, %s2372_s18  ;;  %s1600_s18 = scalar_lea.sflag [#allocation8], %s2577_s4 }
 0x505   : > { %v910_v52 = vpop.permute.xlu0 %909 }
 0x506   : > { %v912_v53 = vsub.f32 %v894_v45, %v910_v52 }
 0x508   : > { %v913_v54 = vmul.f32 1.442695, %v912_v53 }
 0x509   : > { %v931_v55 = vpop.permute.xlu0 %930 }
 0x50a   : > { %2107 = vpow2.f32 %v913_v54  ;;  %1924 = vmatpush3.msra.mxu0 %v931_v55  ;;  %v1122_v55 = vld [vmem:[#allocation4 + $0x10] sm:$0xff] }
 0x50b   : > { %1925 = vmatprep.subr.mxu0 %v2366_v0 }
 0x50d   : > { %v929_v56 = vpop.permute.xlu0 %928 }
 0x50e   : > { %1926 = vmatpush3.msra.mxu0 %v929_v56 }
 0x50f   : > { %1927 = vmatprep.subr.mxu0 %v2366_v0 }
 0x511   : > { %v927_v57 = vpop.permute.xlu0 %926 }
 0x512   : > { %1928 = vmatpush3.msra.mxu0 %v927_v57  ;;  %v711_v57 = vsel %vm415_vm0, %v2695_v39, 0.0  ;;  %v699_v39 = vmul.f32 1.442695, %v698_v33 }
 0x513   : > { %1929 = vmatprep.subr.mxu0 %v2366_v0 }
 0x515   : > { %v925_v58 = vpop.permute.xlu0 %924 }
 0x516   : > { %1930 = vmatpush3.msra.mxu0 %v925_v58 }
 0x517   : > { %v2737_v59 = vpop.eup %2107  ;;  %1934 = vmatprep.subr.mxu0 %v2366_v0 }
 0x518   : > { %1932 = vmatmul.mubr.msk.f32.vlgmr.msra.gmra.mxu0 %vm415_vm0, %v2737_v59  ;;  %v918_v37 = vsel %vm415_vm0, %v2737_v59, 0.0 }
 0x519   : > { %v1023_v60 = vpop.permute.xlu0 %1022  ;;  %1942 = vmatprep.mubr.msk.f32.mxu0 %vm2367_vm1, %v2366_v0 }
 0x51a   : > { %1935 = vmatpush3.xpose.msk.msra.mxu0 %vm607_vm2, %v1023_v60 }
 0x51b   : > { %1936 = vmatprep.subr.mxu0 %v2366_v0 }
 0x51d   : > { %v1021_v61 = vpop.permute.xlu0 %1020 }
 0x51e   : > { %1937 = vmatpush3.xpose.msk.msra.mxu0 %vm607_vm2, %v1021_v61 }
 0x51f   : > { %1938 = vmatprep.subr.mxu0 %v2366_v0 }
 0x521   : > { %v1017_v63 = vpop.permute.xlu0 %1016 }
 0x522   : > { %1939 = vmatpush3.xpose.msk.msra.mxu0 %vm607_vm2, %v1019_v62 }
 0x523   : > { %1940 = vmatprep.subr.mxu0 %v2366_v0 }
 0x525   : > { %v1015_v1 = vpop.permute.xlu0 %1014 }
 0x526   : > { %1941 = vmatpush3.xpose.msk.msra.mxu0 %vm607_vm2, %v1017_v63 }
 0x527   : > { %1967 = vmatprep.subr.mxu0 %v2366_v0 }
 0x529   : > { %1943 = vmatmul.mubr.msk.f32.vlgmr.msra.gmra.mxu0 %vm607_vm2, %v1015_v1 }
 0x52a   : > { %1975 = vmatprep.mubr.msk.f32.mxu0 %vm2367_vm1, %v2366_v0 }
 0x5d8   : > { %v2755_v2 = vpop.f32.mrf.mxu0 }
 0x5da   : > { %v1933_v3 = vpop.f32.mrf.mxu0 }
 0x5e9   : > { %v1100_v4 = vpop.f32.mrf.mxu0 }
 0x5ea   : > { %v1106_v5 = vsel %vm415_vm0, %v1100_v4, -inf }
 0x5eb   : > { %1107 = vmax.xlane.f32.xlu0 %v1106_v5  ;;  %v1944_v6 = vpop.f32.mrf.mxu0 }
 0x601   : > { %1224 = vrot.lane.b32.xlu0 %v2632_v14, %s2374_s13 }
 0x674   : > { %v1108_v8 = vpop.xlane.xlu0 %1107 }
 0x675   : > { %v1109_v9 = vmax.f32 %v1105_v7, %v1108_v8 }
 0x677   : > { %v1110_v10 = vsub.f32 %v1105_v7, %v1109_v9  ;;  %1129 = vst.msk [vmem:[#allocation3 + $0x10] sm:$0xff] %vm490_vm3, %v1109_v9  ;;  %1115 = vperm.xlu1 %2104, %v1109_v9   ;;  %v1328_v9 = vld [vmem:[#allocation4 + $0x18] sm:$0xff] }
 0x678   : > { %v1225_v26 = vpop.permute.xlu0 %1224 }
 0x679   : > { %v1111_v41 = vmul.f32 1.442695, %v1110_v10 }
 0x67b   : > { %1136 = vrot.lane.b32.xlu1 %v2637_v18, %s2375_s17 }
 0x67f   : > { %1134 = vrot.lane.b32.xlu1 %v2643_v19, %s2375_s17 }
 0x683   : > { %1132 = vrot.lane.b32.xlu1 %v2632_v14, %s2375_s17 }
 0x687   : > { %1130 = vrot.lane.b32.xlu1 %v2634_v16, %s2375_s17 }
 0x68b   : > { %1228 = vrot.lane.b32.xlu1 %v2637_v18, %s2374_s13 }
 0x68f   : > { %1226 = vrot.lane.b32.xlu1 %v2643_v19, %s2374_s13 }
 0x693   : > { %1222 = vrot.lane.b32.xlu1 %v2634_v16, %s2374_s13 }
 0x697   : > { %1220 = vrot.lane.b32.xlu1 %v2656_v20, %s2374_s13  ;;  %s2380_s13 = smov [#allocation15]  }
 0x698   : > { %s2269_s27 = sshll.u32 %s2380_s13, 4  ;;  %s2270_s27 = int_to_ptr.vmem [resolvable:$false] %s2269_s27 }
 0x699   : > { %s2271_s21 = scalar_lea.vmem %s2270_s27, 256  ;;  %p2272_p7 = scmp.lt.s32.totalorder %s1615_s11, %s2270_s27 }
 0x69a   : > { %p2273_p1 = scmp.lt.s32.totalorder %s2271_s21, %s2265_s23 }
 0x69c   : > { %p2274_p12 = por %p2273_p1, %p2272_p7 }
 0x69e   : > { %p2275_p9 = pnand %p2274_p12, %p2268_p10 }
 0x6f2   : > { %v1116_v11 = vpop.permute.xlu1 %1115 }
 0x6f3   : > { %v1118_v13 = vsub.f32 %v1100_v4, %v1116_v11 }
 0x6f5   : > { %v1119_v15 = vmul.f32 1.442695, %v1118_v13 }
 0x6f6   : > { %v1137_v17 = vpop.permute.xlu1 %1136 }
 0x6f7   : > { %2109 = vpow2.f32 %v1119_v15  ;;  %1946 = vmatpush3.msra.mxu1 %v1137_v17 }
 0x6f8   : > { %1947 = vmatprep.subr.mxu1 %v2366_v0  ;;  %2111 = vpow2.f32 %v905_v40 }
 0x6f9   : > { %2113 = vpow2.f32 %v1111_v41 }
 0x6fa   : > { %v1135_v21 = vpop.permute.xlu1 %1134 }
 0x6fb   : > { %1948 = vmatpush3.msra.mxu1 %v1135_v21  ;;  %v1493_v21 = vld [vmem:[#allocation14 + $0x18] sm:$0xff] }
 0x6fc   : > { %1949 = vmatprep.subr.mxu1 %v2366_v0 }
 0x6fe   : > { %v1133_v22 = vpop.permute.xlu1 %1132 }
 0x6ff   : > { %1950 = vmatpush3.msra.mxu1 %v1133_v22  ;;  %v1492_v22 = vld [vmem:[#allocation14 + $0x10] sm:$0xff] }
 0x700   : > { %1951 = vmatprep.subr.mxu1 %v2366_v0 }
 0x702   : > { %v1131_v23 = vpop.permute.xlu1 %1130 }
 0x703   : > { %1952 = vmatpush3.msra.mxu1 %v1131_v23 }
 0x704   : > { %v2110_v24 = vpop.eup %2109  ;;  %1956 = vmatprep.subr.mxu1 %v2366_v0 }
 0x705   : > { %1954 = vmatmul.mubr.msk.f32.vlgmr.msra.gmra.mxu1 %vm415_vm0, %v2110_v24  ;;  %v1124_v38 = vsel %vm415_vm0, %v2110_v24, 0.0  ;;  %v2112_v44 = vpop.eup %2111 }
 0x706   : > { %v1229_v20 = vpop.permute.xlu1 %1228  ;;  %1964 = vmatprep.mubr.msk.f32.mxu1 %vm2367_vm1, %v2366_v0  ;;  %v917_v52 = vmul.f32 %v2112_v44, %v916_v46  ;;  %v2114_v53 = vpop.eup %2113 }
 0x707   : > { %1957 = vmatpush3.xpose.msk.msra.mxu1 %vm607_vm2, %v1229_v20  ;;  %v1123_v48 = vmul.f32 %v2114_v53, %v1122_v55  ;;  %v1491_v20 = vld [vmem:[#allocation14 + $0x8] sm:$0xff] }
 0x708   : > { %1958 = vmatprep.subr.mxu1 %v2366_v0 }
 0x70a   : > { %v1227_v25 = vpop.permute.xlu1 %1226 }
 0x70b   : > { %1959 = vmatpush3.xpose.msk.msra.mxu1 %vm607_vm2, %v1227_v25  ;;  %v1490_v25 = vld [vmem:[#allocation14] sm:$0xff] }
 0x70c   : > { %1960 = vmatprep.subr.mxu1 %v2366_v0 }
 0x70e   : > { %v1223_v27 = vpop.permute.xlu1 %1222 }
 0x70f   : > { %1961 = vmatpush3.xpose.msk.msra.mxu1 %vm607_vm2, %v1225_v26 }
 0x710   : > { %1962 = vmatprep.subr.mxu1 %v2366_v0 }
 0x712   : > { %v1221_v28 = vpop.permute.xlu1 %1220 }
 0x713   : > { %1963 = vmatpush3.xpose.msk.msra.mxu1 %vm607_vm2, %v1223_v27 }
 0x716   : > { %1965 = vmatmul.mubr.msk.f32.vlgmr.msra.gmra.mxu1 %vm607_vm2, %v1221_v28 }
 0x7c5   : > { %v2783_v29 = vpop.f32.mrf.mxu1 }
 0x7c7   : > { %v1955_v31 = vpop.f32.mrf.mxu1 }
 0x7d6   : > { %v1306_v34 = vpop.f32.mrf.mxu1 }
 0x7d7   : > { %v1312_v35 = vsel %vm415_vm0, %v1306_v34, -inf }
 0x7d8   : > { %1313 = vmax.xlane.f32.xlu1 %v1312_v35  ;;  %v1966_v36 = vpop.f32.mrf.mxu1 }
 0x7dc   : > { %919 = vadd.xlane.f32.xlu1 %v918_v37 }
 0x7e0   : > { %1125 = vadd.xlane.f32.xlu1 %v1124_v38  ;;  %v1446_v38 = vld [vmem:[#allocation5] sm:$0xff] }
 0x861   : > { %v1314_v45 = vpop.xlane.xlu1 %1313 }
 0x862   : > { %v1315_v47 = vmax.f32 %v1311_v42, %v1314_v45 }
 0x864   : > { %v1316_v49 = vsub.f32 %v1311_v42, %v1315_v47  ;;  %1335 = vst.msk [vmem:[#allocation3 + $0x18] sm:$0xff] %vm490_vm3, %v1315_v47  ;;  %1321 = vperm.xlu0 %2103, %v1315_v47  }
 0x865   : > { %v920_v54 = vpop.xlane.xlu1 %919 }
 0x866   : > { %v921_v56 = vadd.f32 %v920_v54, %v917_v52  ;;  %v1317_v63 = vmul.f32 1.442695, %v1316_v49 }
 0x868   : > { %922 = vst.msk [vmem:[#allocation4 + $0x8] sm:$0xff] %vm490_vm3, %v921_v56  ;;  %1342 = vrot.lane.b32.xlu0 %v2637_v18, %s2376_s20 }
 0x869   : > { %v1126_v50 = vpop.xlane.xlu1 %1125 }
 0x86a   : > { %v1127_v51 = vadd.f32 %v1126_v50, %v1123_v48 }
 0x86c   : > { %1128 = vst.msk [vmem:[#allocation4 + $0x10] sm:$0xff] %vm490_vm3, %v1127_v51  ;;  %1340 = vrot.lane.b32.xlu0 %v2643_v19, %s2376_s20 }
 0x86f   : > { %v1461_v13 = vld [vmem:[#allocation4 + $0x8] sm:$0xff] }
 0x870   : > { %1338 = vrot.lane.b32.xlu0 %v2632_v14, %s2376_s20 }
 0x873   : > { %v1469_v6 = vld [vmem:[#allocation4 + $0x10] sm:$0xff] }
 0x874   : > { %1336 = vrot.lane.b32.xlu0 %v2634_v16, %s2376_s20 }
 0x893   : > { %712 = vadd.xlane.f32.xlu0 %v711_v57 }
 0x8a9   : > { %1011 = vperm.xlu0 %2103, %v2112_v44  }
 0x8df   : > { %v1322_v58 = vpop.permute.xlu0 %1321 }
 0x8e0   : > { %v1324_v59 = vsub.f32 %v1306_v34, %v1322_v58 }
 0x8e2   : > { %v1325_v60 = vmul.f32 1.442695, %v1324_v59 }
 0x8e3   : > { %v1343_v18 = vpop.permute.xlu0 %1342 }
 0x8e4   : > { %2115 = vpow2.f32 %v1325_v60  ;;  %1968 = vmatpush3.msra.mxu0 %v1343_v18 }
 0x8e5   : > { %1969 = vmatprep.subr.mxu0 %v2366_v0  ;;  %2117 = vpow2.f32 %v699_v39 }
 0x8e6   : > { %2119 = vpow2.f32 %v1317_v63 }
 0x8e7   : > { %v1341_v61 = vpop.permute.xlu0 %1340 }
 0x8e8   : > { %1970 = vmatpush3.msra.mxu0 %v1341_v61 }
 0x8e9   : > { %1971 = vmatprep.subr.mxu0 %v2366_v0 }
 0x8eb   : > { %v1339_v14 = vpop.permute.xlu0 %1338 }
 0x8ec   : > { %1972 = vmatpush3.msra.mxu0 %v1339_v14 }
 0x8ed   : > { %1973 = vmatprep.subr.mxu0 %v2366_v0 }
 0x8ef   : > { %v1337_v16 = vpop.permute.xlu0 %1336 }
 0x8f0   : > { %1974 = vmatpush3.msra.mxu0 %v1337_v16 }
 0x8f1   : > { %v2116_v19 = vpop.eup %2115  ;;  %1978 = vmatprep.subr.mxu0 %v2366_v0 }
 0x8f2   : > { %1976 = vmatmul.mubr.msk.f32.vlgmr.msra.gmra.mxu0 %vm415_vm0, %v2116_v19  ;;  %v1330_v62 = vsel %vm415_vm0, %v2116_v19, 0.0  ;;  %v2118_v1 = vpop.eup %2117 }
 0x8f3   : > { %1331 = vadd.xlane.f32.xlu1 %v1330_v62  ;;  %1986 = vmatprep.mubr.msk.f32.mxu0 %vm2367_vm1, %v2366_v0  ;;  %v2120_v3 = vpop.eup %2119  ;;  %v710_v32 = vmul.f32 %v2118_v1, %v709_v30  ;;  %v1800_v62 = vld [vmem:[%s2888_s5] ss:$0 sm:$0xff] }
 0x8f4   : > { %v1329_v10 = vmul.f32 %v2120_v3, %v1328_v9  ;;  %1979 = vmatpush3.msra.mxu0 %v1493_v21 }
 0x8f5   : > { %1980 = vmatprep.subr.mxu0 %v2366_v0 }
 0x8f6   : > { %1981 = vmatpush3.msra.mxu0 %v1492_v22 }
 0x8f7   : > { %1982 = vmatprep.subr.mxu0 %v2366_v0 }
 0x8f8   : > { %1983 = vmatpush3.msra.mxu0 %v1491_v20 }
 0x8f9   : > { %1984 = vmatprep.subr.mxu0 %v2366_v0 }
 0x8fa   : > { %1985 = vmatpush3.msra.mxu0 %v1490_v25 }
 0x904   : > { %805 = vperm.xlu1 %2104, %v2118_v1   ;;  %v1801_v1 = vld [vmem:[%s2889_s6] ss:$0 sm:$0xff] }
 0x908   : > { %1217 = vperm.xlu1 %2104, %v2114_v53  }
 0x90c   : > { %1423 = vperm.xlu1 %2104, %v2120_v3  }
 0x910   : > { %1432 = vrot.lane.b32.xlu1 %v2755_v2, %s2377_s16 }
 0x914   : > { %1436 = vrot.lane.b32.xlu1 %v2783_v29, %s2378_s8 }
 0x91c   : > { %v713_v33 = vpop.xlane.xlu0 %712 }
 0x91d   : > { %v714_v4 = vadd.f32 %v713_v33, %v710_v32 }
 0x91f   : > { %716 = vst.msk [vmem:[#allocation4] sm:$0xff] %vm490_vm3, %v714_v4 }
 0x924   : > { %v1012_v34 = vpop.permute.xlu0 %1011 }
 0x926   : > { %v1453_v5 = vld [vmem:[#allocation4] sm:$0xff] }
 0x927   : > { %2121 = vrcp.f32 %v1453_v5 }
 0x928   : > { %2123 = vrcp.f32 %v1469_v6 }
 0x929   : > { %2125 = vrcp.f32 %v1461_v13 }
 0x934   : > { %v2122_v7 = vpop.eup %2121 }
 0x935   : > { %1458 = vperm.xlu0 %2103, %v2122_v7   ;;  %v2124_v8 = vpop.eup %2123 }
 0x936   : > { %v2126_v24 = vpop.eup %2125 }
 0x939   : > { %1474 = vperm.xlu0 %2103, %v2124_v8  }
 0x97c   : > { %v1332_v2 = vpop.xlane.xlu1 %1331 }
 0x97d   : > { %v1333_v11 = vadd.f32 %v1332_v2, %v1329_v10 }
 0x97f   : > { %1334 = vst.msk [vmem:[#allocation4 + $0x18] sm:$0xff] %vm490_vm3, %v1333_v11 }
 0x980   : > { %v806_v27 = vpop.permute.xlu1 %805 }
 0x981   : > { %v1426_v35 = vsel %vm607_vm2, %v806_v27, %v1012_v34 }
 0x984   : > { %v1218_v28 = vpop.permute.xlu1 %1217 }
 0x985   : > { %v1428_v36 = vsel %vm1427_vm4, %v1426_v35, %v1218_v28 }
 0x986   : > { %v1477_v15 = vld [vmem:[#allocation4 + $0x18] sm:$0xff] }
 0x987   : > { %2127 = vrcp.f32 %v1477_v15 }
 0x988   : > { %v1424_v29 = vpop.permute.xlu1 %1423 }
 0x989   : > { %v1430_v40 = vsel %vm1429_vm5, %v1428_v36, %v1424_v29 }
 0x98a   : > { %v1447_v41 = vmul.f32 %v1446_v38, %v1430_v40 }
 0x98c   : > { %v1433_v31 = vpop.permute.xlu1 %1432 }
 0x98d   : > { %v1443_v0 = vsel %vm607_vm2, %v2712_v43, %v1433_v31 }
 0x990   : > { %v1437_v37 = vpop.permute.xlu1 %1436 }
 0x991   : > { %v1444_v42 = vsel %vm1427_vm4, %v1443_v0, %v1437_v37 }
 0x994   : > { %v2128_v26 = vpop.eup %2127 }
 0x9b0   : > { %v1459_v47 = vpop.permute.xlu0 %1458 }
 0x9b2   : > { %v1417_v17 = vpop.f32.mrf.mxu0 }
 0x9b3   : > { %1440 = vrot.lane.b32.xlu1 %v1417_v17, %s2379_s12 }
 0x9b4   : > { %v1977_v23 = vpop.f32.mrf.mxu0  ;;  %v1475_v53 = vpop.permute.xlu0 %1474 }
 0x9b7   : > { %1466 = vperm.xlu1 %2104, %v2126_v24  }
 0x9bb   : > { %1482 = vperm.xlu1 %2104, %v2128_v26  }
 0xa25   : > { %v1441_v44 = vpop.permute.xlu1 %1440 }
 0xa26   : > { %v1445_v45 = vsel %vm1429_vm5, %v1444_v42, %v1441_v44 }
 0xa27   : > { %v1448_v46 = vadd.f32 %v1447_v41, %v1445_v45 }
 0xa29   : > { %1449 = vst.msk [vmem:[#allocation5] sm:$0xff] %vm415_vm0, %v1448_v46 }
 0xa30   : > { %v1488_v56 = vld [vmem:[#allocation5] sm:$0xff] }
 0xa32   : > { %v1467_v49 = vpop.permute.xlu1 %1466 }
 0xa33   : > { %v1485_v52 = vsel %vm607_vm2, %v1459_v47, %v1467_v49 }
 0xa34   : > { %v1486_v54 = vsel %vm1427_vm4, %v1485_v52, %v1475_v53 }
 0xa36   : > { %v1483_v55 = vpop.permute.xlu1 %1482 }
 0xa37   : > { %v1487_v43 = vsel %vm1429_vm5, %v1486_v54, %v1483_v55 }
 0xa38   : > { %v1489_v48 = vmul.f32 %v1488_v56, %v1487_v43 }
 0xa3a   : > { %1987 = vmatmul.mubr.msk.f32.vlgmr.msra.gmra.mxu0 %vm415_vm0, %v1489_v48 }
 0xafa   : > { %v1564_v50 = vpop.f32.mrf.mxu0 }
 0xafb   : > { %v1565_v51 = vadd.f32 %v1564_v50, %v2617_v12 }
 0xafc   : > { %v1988_v57 = vpop.f32.mrf.mxu0 }
 0xafd   : > { %v1568_v58 = vsel %vm415_vm0, %v1565_v51, 0.0 }
 0xafe   : > { %1569 = vadd.xlane.f32.xlu0 %v1568_v58 }
 0xb87   : > { %v1570_v59 = vpop.xlane.xlu0 %1569 }
 0xb88   : > { %v1572_v60 = vmul.f32 0.03125, %v1570_v59 }
 0xb8a   : > { %v1573_v18 = vsub.f32 %v1565_v51, %v1572_v60 }
 0xb8c   : > { %v1574_v61 = vmul.f32 %v1573_v18, %v1573_v18 }
 0xb8e   : > { %v1575_v14 = vsel %vm415_vm0, %v1574_v61, 0.0 }
 0xb8f   : > { %1576 = vadd.xlane.f32.xlu1 %v1575_v14 }
 0xc18   : > { %v1577_v16 = vpop.xlane.xlu1 %1576 }
 0xc19   : > { %v1578_v19 = vmul.f32 0.03125, %v1577_v16 }
 0xc1b   : > { %v1579_v39 = vadd.f32 1e-06, %v1578_v19 }
 0xc1d   : > { %2129 = vrsqrt.f32 %v1579_v39 }
 0xc2a   : > { %v2130_v12 = vpop.eup %2129 }
 0xc2b   : > { %v1581_v63 = vmul.f32 %v2130_v12, %v1573_v18 }
 0xc2d   : > { %v1589_v3 = vmul.f32 %v1800_v62, %v1581_v63 }
 0xc2f   : > { %v1597_v30 = vadd.f32 %v1801_v1, %v1589_v3 }
 0xc31   : > { %1598 = vst.msk [vmem:[%s404_s28] sm:$0xff] %vm415_vm0, %v1597_v30 }
 0xc32   : > { %2278 = shalt.err (!%p2275_p9)
}
 0xc33   : > { %s2279_s17 = scalar_lea.hbm %s1612_s9, 128  ;;  %s2283_s16 = scalar_lea.hbm %s2890_s7, 256 }
 0xc34   : > { %p2280_p0 = scmp.ne.s32.totalorder %s1612_s9, %s2279_s17  ;;  %p2284_p5 = scmp.lt.s32.totalorder %s1612_s9, %s2890_s7 }
 0xc35   : > { %p2285_p3 = scmp.lt.s32.totalorder %s2283_s16, %s2279_s17 }
 0xc36   : > { %p2281_p8 = pnand %p2280_p0, %p2526_p13 }
 0xc37   : > { %p2286_p4 = por %p2285_p3, %p2284_p5 }
 0xc38   : > { %p2282_p2 = pneg %p2281_p8 }
 0xc3a   : > { %p2287_p11 = pnand %p2286_p4, %p2282_p2 }
 0xc3c   : > { %2290 = shalt.err (!%p2287_p11)
}
 0xc3d   : > { %2005 = dma.vmem_to_hbm [thread:$0]  (%p2526_p13), %s1615_s11, 128, %s1612_s9, %s1600_s18  }
 0xc3e PF: > { %s1626_s0 = sand.u32 1, %s2337_s24   ;;  %p2919_p10 = scmp.ge.s32.totalorder %s2357_s29, 2 }
 0xc3f   : > { %s1627_s3 = scalar_lea.sflag [#allocation8], %s1626_s0 }
 0xc40   : > { %p2025_p7 = pnand %p2919_p10, %p2466_p6 }
 0xc42   : > { %p2026_p1 = pneg %p2025_p7 }
 0xc44   : > { %2332 = dma.done.wait (%p2026_p1), %s1627_s3, 128  }
 0xc45   : > { %2334 = vsyncadd (%p2026_p1), %s1627_s3, 4294967168  ;;  %s27_s29 = sadd.s32 1, %s2357_s29   ;;  %s2920_s14 = sld [smem:[#allocation23_spill]] }
 0xc46   : > { %p24_p12 = scmp.ge.s32.totalorder %s27_s29, 4   ;;  %s2921_s27 = sld [smem:[#allocation21_spill]] }
 0xc47   : > { %s2922_s28 = sld [smem:[#allocation22_spill]]  ;;  %s2923_s24 = smov %s2341_s25 }
 0xc48   : > { %s2924_s25 = smov %s2345_s26  ;;  %26 = sbr.rel (!%p24_p12) target bundleno = 14 (0xe), region = 132 }
 0xc4b   : > { %s2925_s26 = smov %s2920_s14 }
 0xc4d   :  { %1632 = vsyncpa [#allocation7], 1 }
 0xc4e   :  { %1634 = vsyncpa [#allocation7 + $0x1], 1 }
 0xc4f   :  { %1635 = vsyncpa [#allocation10], 1 }
 0xc50   :  { %1637 = vsyncpa [#allocation10 + $0x1], 1 }
 0xc51   :  { %1638 = vsyncpa [#allocation13], 1 }
 0xc52   :  { %1639 = vsyncpa [#allocation8], 1 }
 0xc53   :  { %1641 = vsyncpa [#allocation8 + $0x1], 1 }

</bundles_post_ra>
